<compile_context>
chip_gen: v7x
topology: tpu7x:2x2x1
jax: 0.10.0
libtpu: 0.0.40
codegen_flags: <defaults>
</compile_context>

<pallas_src>
import functools

import jax
import jax.numpy as jnp
from jax.experimental import pallas as pl
from jax.experimental.pallas import tpu as pltpu


def _leaky_relu(x, slope=0.2):
    return jnp.where(x > 0, x, slope * x)


def _round_up(x, m):
    return (x + m - 1) // m * m


def dense_decoder_kernel(z_ref, w1_ref, b1_ref, w2_ref, b2_ref, w3_ref, b3_ref,
                         o_ref):
    # Layer 1: Linear + LeakyReLU(0.2)   (f32 accumulation on the MXU)
    h = jnp.dot(z_ref[...], w1_ref[...], preferred_element_type=jnp.float32)
    h = _leaky_relu(h + b1_ref[...])
    # Layer 2: Linear + LeakyReLU(0.2)
    h = jnp.dot(h.astype(w2_ref.dtype), w2_ref[...],
                preferred_element_type=jnp.float32)
    h = _leaky_relu(h + b2_ref[...])
    # Layer 3: Linear (no activation)
    out = jnp.dot(h.astype(w3_ref.dtype), w3_ref[...],
                  preferred_element_type=jnp.float32)
    o_ref[...] = (out + b3_ref[...]).astype(o_ref.dtype)


@functools.partial(jax.jit, static_argnames=("batch_tile", "compute_dtype"))
def dense_decoder(z, params, *, batch_tile=512, compute_dtype=jnp.float32):
    """Fused 3-layer MLP decoder.

    z: [B, latent_dim] float32
    params: ((w1, b1), (w2, b2), (w3, b3)) with w_i of shape (in, out),
            b_i of shape (1, out)  (transposed vs. PyTorch nn.Linear.weight).
    batch_tile: rows of z processed per grid step (multiple of 8; large tiles
                amortize the ~0.35 us per-step overhead, clamped to the batch).
    compute_dtype: dtype of the MXU operands (jnp.float32 or jnp.bfloat16);
                   accumulation and biases stay in float32.
    """
    (w1, b1), (w2, b2), (w3, b3) = params
    B, latent_dim = z.shape
    h1 = w1.shape[1]
    h2 = w2.shape[1]
    out_dim = w3.shape[1]

    # Lane-pad every feature dimension to a multiple of 128 (zero padding is
    # exact: padded K rows are zero, padded N cols are sliced off below).
    k_pad = _round_up(latent_dim, 128)
    h1_p = _round_up(h1, 128)
    h2_p = _round_up(h2, 128)
    n_pad = _round_up(out_dim, 128)

    # Batch tiling: clamp the tile to the (8-rounded) batch and pad B up.
    bt = max(8, min(_round_up(batch_tile, 8), _round_up(B, 8)))
    b_pad = _round_up(B, bt)

    cd = compute_dtype
    z_p = jnp.zeros((b_pad, k_pad), cd).at[:B, :latent_dim].set(z.astype(cd))
    w1_p = jnp.zeros((k_pad, h1_p), cd).at[:latent_dim, :h1].set(w1.astype(cd))
    b1_p = jnp.zeros((1, h1_p), jnp.float32).at[:, :h1].set(
        b1.astype(jnp.float32))
    w2_p = jnp.zeros((h1_p, h2_p), cd).at[:h1, :h2].set(w2.astype(cd))
    b2_p = jnp.zeros((1, h2_p), jnp.float32).at[:, :h2].set(
        b2.astype(jnp.float32))
    w3_p = jnp.zeros((h2_p, n_pad), cd).at[:h2, :out_dim].set(w3.astype(cd))
    b3_p = jnp.zeros((1, n_pad), jnp.float32).at[:, :out_dim].set(
        b3.astype(jnp.float32))

    grid = (b_pad // bt,)

    batch_map = lambda i: (i, 0)   # tiles over the batch axis
    const_map = lambda i: (0, 0)   # weights/biases: resident, one block

    out_padded = pl.pallas_call(
        dense_decoder_kernel,
        out_shape=jax.ShapeDtypeStruct((b_pad, n_pad), jnp.float32),
        grid_spec=pl.GridSpec(
            grid=grid,
            in_specs=[
                pl.BlockSpec((bt, k_pad), batch_map),     # z tile
                pl.BlockSpec((k_pad, h1_p), const_map),   # w1
                pl.BlockSpec((1, h1_p), const_map),       # b1
                pl.BlockSpec((h1_p, h2_p), const_map),    # w2
                pl.BlockSpec((1, h2_p), const_map),       # b2
                pl.BlockSpec((h2_p, n_pad), const_map),   # w3
                pl.BlockSpec((1, n_pad), const_map),      # b3
            ],
            out_specs=pl.BlockSpec((bt, n_pad), batch_map),
        ),
        compiler_params=pltpu.CompilerParams(
            dimension_semantics=("parallel",),
            vmem_limit_bytes=64 * 1024 * 1024,
        ),
    )(z_p, w1_p, b1_p, w2_p, b2_p, w3_p, b3_p)

    return out_padded[:B, :out_dim].astype(z.dtype)


def init_params(key, latent_dim, output_dim, layer_sizes=(128, 512)):
    """Deterministic init mimicking torch.nn.Linear default (uniform +-1/sqrt(fan_in))."""
    dims = [latent_dim] + list(layer_sizes) + [output_dim]
    params = []
    for i in range(1, len(dims)):
        fan_in, fan_out = dims[i - 1], dims[i]
        key, kw, kb = jax.random.split(key, 3)
        bound = 1.0 / jnp.sqrt(fan_in)
        w = jax.random.uniform(kw, (fan_in, fan_out), jnp.float32,
                               minval=-bound, maxval=bound)
        b = jax.random.uniform(kb, (1, fan_out), jnp.float32,
                               minval=-bound, maxval=bound)
        params.append((w, b))
    return tuple(params)


def dense_decoder_ref(z, params):
    (w1, b1), (w2, b2), (w3, b3) = params
    h = _leaky_relu(z @ w1 + b1)
    h = _leaky_relu(h @ w2 + b2)
    return h @ w3 + b3


if __name__ == "__main__":
    key = jax.random.PRNGKey(0)
    latent_dim, output_dim, batch = 32, 64, 128

    k_params, k_z = jax.random.split(key)
    params = init_params(k_params, latent_dim, output_dim)
    z = jax.random.normal(k_z, (batch, latent_dim), jnp.float32)

    ref = dense_decoder_ref(z, params)

    # f32 operand path (exact check).
    out = jax.block_until_ready(dense_decoder(z, params))
    assert out.shape == (batch, output_dim)
    assert jnp.allclose(out, ref, atol=1e-4, rtol=1e-4), "f32 mismatch vs reference"

    # bf16 operand path (MXU-friendly on v6e/v7x), f32 accumulation.
    out_bf16 = jax.block_until_ready(
        dense_decoder(z, params, compute_dtype=jnp.bfloat16))
    assert out_bf16.shape == (batch, output_dim)
    assert jnp.allclose(out_bf16, ref, atol=5e-2, rtol=5e-2), "bf16 mismatch vs reference"

    # Odd / non-multiple batch size exercises the batch-padding path.
    z_small = z[:37]
    out_small = jax.block_until_ready(dense_decoder(z_small, params))
    assert out_small.shape == (37, output_dim)
    assert jnp.allclose(out_small, ref[:37], atol=1e-4, rtol=1e-4), "padded-batch mismatch"

    print("KERNEL_OK")
</pallas_src>

<mosaic_0001>
module attributes {stable_mosaic.version = 11 : i64} {
  func.func @dense_decoder_kernel(%arg0: i32, %arg1: memref<128x128xf32, #tpu.memory_space<vmem>>, %arg2: memref<128x128xf32, #tpu.memory_space<vmem>>, %arg3: memref<1x128xf32, #tpu.memory_space<vmem>>, %arg4: memref<128x512xf32, #tpu.memory_space<vmem>>, %arg5: memref<1x512xf32, #tpu.memory_space<vmem>>, %arg6: memref<512x128xf32, #tpu.memory_space<vmem>>, %arg7: memref<1x128xf32, #tpu.memory_space<vmem>>, %arg8: memref<128x128xf32, #tpu.memory_space<vmem>>) attributes {dimension_semantics = [#tpu.dimension_semantics<parallel>], iteration_bounds = array<i64: 1>, scalar_prefetch = 0 : i64, scratch_operands = 0 : i64, tpu.core_type = #tpu.core_type<tc>, window_params = [{transform_indices = @transform_0, window_bounds = array<i64: 128, 128>}, {pipeline_mode = #tpu.pipeline_mode<synchronous>, transform_indices = @transform_1, window_bounds = array<i64: 128, 128>}, {pipeline_mode = #tpu.pipeline_mode<synchronous>, transform_indices = @transform_2, window_bounds = array<i64: 1, 128>}, {pipeline_mode = #tpu.pipeline_mode<synchronous>, transform_indices = @transform_3, window_bounds = array<i64: 128, 512>}, {pipeline_mode = #tpu.pipeline_mode<synchronous>, transform_indices = @transform_4, window_bounds = array<i64: 1, 512>}, {pipeline_mode = #tpu.pipeline_mode<synchronous>, transform_indices = @transform_5, window_bounds = array<i64: 512, 128>}, {pipeline_mode = #tpu.pipeline_mode<synchronous>, transform_indices = @transform_6, window_bounds = array<i64: 1, 128>}, {transform_indices = @transform_7, window_bounds = array<i64: 128, 128>}]} {
    %c0 = arith.constant 0 : index
    %c0_0 = arith.constant 0 : index
    %0 = vector.load %arg1[%c0, %c0_0] : memref<128x128xf32, #tpu.memory_space<vmem>>, vector<128x128xf32>
    %c0_1 = arith.constant 0 : index
    %c0_2 = arith.constant 0 : index
    %1 = vector.load %arg2[%c0_1, %c0_2] : memref<128x128xf32, #tpu.memory_space<vmem>>, vector<128x128xf32>
    %cst = arith.constant dense<0.000000e+00> : vector<128x128xf32>
    %2 = tpu.matmul %0, %1, %cst {dimension_numbers = #tpu.dot_dimension_numbers<[1], [0], [0], [1], [0, 0, 1, 1], [], []>} : vector<128x128xf32>, vector<128x128xf32>, vector<128x128xf32> -> vector<128x128xf32>
    %c0_3 = arith.constant 0 : index
    %c0_4 = arith.constant 0 : index
    %3 = vector.load %arg3[%c0_3, %c0_4] : memref<1x128xf32, #tpu.memory_space<vmem>>, vector<1x128xf32>
    %4 = vector.broadcast %3 : vector<1x128xf32> to vector<128x128xf32>
    %5 = arith.addf %2, %4 : vector<128x128xf32>
    %cst_5 = arith.constant 0.000000e+00 : f32
    %6 = vector.broadcast %cst_5 : f32 to vector<128x128xf32>
    %7 = arith.cmpf ogt, %5, %6 : vector<128x128xf32>
    %cst_6 = arith.constant 2.000000e-01 : f32
    %8 = vector.broadcast %cst_6 : f32 to vector<128x128xf32>
    %9 = arith.mulf %8, %5 : vector<128x128xf32>
    %10 = arith.select %7, %5, %9 : vector<128x128xi1>, vector<128x128xf32>
    %c0_7 = arith.constant 0 : index
    %c0_8 = arith.constant 0 : index
    %11 = vector.load %arg4[%c0_7, %c0_8] : memref<128x512xf32, #tpu.memory_space<vmem>>, vector<128x512xf32>
    %cst_9 = arith.constant dense<0.000000e+00> : vector<128x512xf32>
    %12 = tpu.matmul %10, %11, %cst_9 {dimension_numbers = #tpu.dot_dimension_numbers<[1], [0], [0], [1], [0, 0, 1, 1], [], []>} : vector<128x128xf32>, vector<128x512xf32>, vector<128x512xf32> -> vector<128x512xf32>
    %c0_10 = arith.constant 0 : index
    %c0_11 = arith.constant 0 : index
    %13 = vector.load %arg5[%c0_10, %c0_11] : memref<1x512xf32, #tpu.memory_space<vmem>>, vector<1x512xf32>
    %14 = vector.broadcast %13 : vector<1x512xf32> to vector<128x512xf32>
    %15 = arith.addf %12, %14 : vector<128x512xf32>
    %cst_12 = arith.constant 0.000000e+00 : f32
    %16 = vector.broadcast %cst_12 : f32 to vector<128x512xf32>
    %17 = arith.cmpf ogt, %15, %16 : vector<128x512xf32>
    %cst_13 = arith.constant 2.000000e-01 : f32
    %18 = vector.broadcast %cst_13 : f32 to vector<128x512xf32>
    %19 = arith.mulf %18, %15 : vector<128x512xf32>
    %20 = arith.select %17, %15, %19 : vector<128x512xi1>, vector<128x512xf32>
    %c0_14 = arith.constant 0 : index
    %c0_15 = arith.constant 0 : index
    %21 = vector.load %arg6[%c0_14, %c0_15] : memref<512x128xf32, #tpu.memory_space<vmem>>, vector<512x128xf32>
    %cst_16 = arith.constant dense<0.000000e+00> : vector<128x128xf32>
    %22 = tpu.matmul %20, %21, %cst_16 {dimension_numbers = #tpu.dot_dimension_numbers<[1], [0], [0], [1], [0, 0, 1, 1], [], []>} : vector<128x512xf32>, vector<512x128xf32>, vector<128x128xf32> -> vector<128x128xf32>
    %c0_17 = arith.constant 0 : index
    %c0_18 = arith.constant 0 : index
    %23 = vector.load %arg7[%c0_17, %c0_18] : memref<1x128xf32, #tpu.memory_space<vmem>>, vector<1x128xf32>
    %24 = vector.broadcast %23 : vector<1x128xf32> to vector<128x128xf32>
    %25 = arith.addf %22, %24 : vector<128x128xf32>
    %c0_19 = arith.constant 0 : index
    %c0_20 = arith.constant 0 : index
    %26 = vector.load %arg8[%c0_19, %c0_20] : memref<128x128xf32, #tpu.memory_space<vmem>>, vector<128x128xf32>
    tpu.vector_store %arg8[%c0_19, %c0_20], %25 {strides = array<i32>} : memref<128x128xf32, #tpu.memory_space<vmem>>, vector<128x128xf32>,
    return
  }
  func.func @transform_0(%arg0: i32) -> (i32, i32) {
    %c0_i32 = arith.constant 0 : i32
    %c0_i32_0 = arith.constant 0 : i32
    return %arg0, %c0_i32 : i32, i32
  }
  func.func @transform_1(%arg0: i32) -> (i32, i32) {
    %c0_i32 = arith.constant 0 : i32
    %c0_i32_0 = arith.constant 0 : i32
    %c0_i32_1 = arith.constant 0 : i32
    return %c0_i32, %c0_i32_0 : i32, i32
  }
  func.func @transform_2(%arg0: i32) -> (i32, i32) {
    %c0_i32 = arith.constant 0 : i32
    %c0_i32_0 = arith.constant 0 : i32
    %c0_i32_1 = arith.constant 0 : i32
    return %c0_i32, %c0_i32_0 : i32, i32
  }
  func.func @transform_3(%arg0: i32) -> (i32, i32) {
    %c0_i32 = arith.constant 0 : i32
    %c0_i32_0 = arith.constant 0 : i32
    %c0_i32_1 = arith.constant 0 : i32
    return %c0_i32, %c0_i32_0 : i32, i32
  }
  func.func @transform_4(%arg0: i32) -> (i32, i32) {
    %c0_i32 = arith.constant 0 : i32
    %c0_i32_0 = arith.constant 0 : i32
    %c0_i32_1 = arith.constant 0 : i32
    return %c0_i32, %c0_i32_0 : i32, i32
  }
  func.func @transform_5(%arg0: i32) -> (i32, i32) {
    %c0_i32 = arith.constant 0 : i32
    %c0_i32_0 = arith.constant 0 : i32
    %c0_i32_1 = arith.constant 0 : i32
    return %c0_i32, %c0_i32_0 : i32, i32
  }
  func.func @transform_6(%arg0: i32) -> (i32, i32) {
    %c0_i32 = arith.constant 0 : i32
    %c0_i32_0 = arith.constant 0 : i32
    %c0_i32_1 = arith.constant 0 : i32
    return %c0_i32, %c0_i32_0 : i32, i32
  }
  func.func @transform_7(%arg0: i32) -> (i32, i32) {
    %c0_i32 = arith.constant 0 : i32
    %c0_i32_0 = arith.constant 0 : i32
    return %arg0, %c0_i32 : i32, i32
  }
}

</mosaic_0001>

<bundles_post_ra>
// kernel: dense_decoder.1
= control target key start
LH: loop header
LB: loop body
LE: loop exit
PB: predicated region body
PF: predicated region fallthrough
CT: control target
= control target key end

     0   :  { %12 = vsyncpa [#allocation3], 0  ;;  %s2388_s0 = inlined_call_operand.hbm [shape: f32[128,128], index: 0, kind: input, shape index: {}]   ;;  %s2389_s1 = inlined_call_operand.hbm [shape: f32[128,128], index: 1, kind: input, shape index: {}]   ;;  %s2390_s2 = inlined_call_operand.hbm [shape: f32[1,128], index: 2, kind: input, shape index: {}]   ;;  %s2391_s3 = inlined_call_operand.hbm [shape: f32[128,512], index: 3, kind: input, shape index: {}]   ;;  %s2392_s4 = inlined_call_operand.hbm [shape: f32[1,512], index: 4, kind: input, shape index: {}]   ;;  %s2393_s5 = inlined_call_operand.hbm [shape: f32[512,128], index: 5, kind: input, shape index: {}]   ;;  %s2394_s6 = inlined_call_operand.hbm [shape: f32[1,128], index: 6, kind: input, shape index: {}]   ;;  %s2395_s7 = inlined_call_operand.hbm [shape: f32[128,128], index: 7, kind: output, shape index: {}]  }
   0x1   :  { %13 = vsyncpa [#allocation6], 0 }
   0x2   :  { %14 = vsyncpa [#allocation9], 0 }
   0x3   :  { %15 = vsyncpa [#allocation12], 0 }
   0x4   :  { %16 = vsyncpa [#allocation4], 0  ;;  %s1970_s24 = smov [#allocation5]   ;;  %s1971_s26 = smov [#allocation8]  }
   0x5   :  { %s34_s25 = sshll.u32 %s1970_s24, 4  ;;  %s56_s27 = sshll.u32 %s1971_s26, 4  ;;  %s35_s25 = int_to_ptr.vmem [resolvable:$true] %s34_s25  ;;  %s2023_s27 = int_to_ptr.vmem [resolvable:$true] %s56_s27 }
   0x6   :  { %s1784_s30 = scalar_lea.hbm %s2389_s1, 2048 }
   0x7   :  { %p1785_p0 = scmp.ne.s32.totalorder %s2389_s1, %s1784_s30  ;;  %p1788_p1 = scmp.lt.u32.totalorder %s1784_s30, %s2389_s1 }
   0x9   :  { %p1790_p2 = pnand %p1788_p1, %p1785_p0 }
   0xb   :  { %1793 = shalt.err (!%p1790_p2)
}
   0xc   :  { %s1794_s12 = scalar_lea.vmem %s35_s25, 2048  ;;  %p1799_p4 = scmp.lt.s32.totalorder %s35_s25, %s35_s25 }
   0xd   :  { %p1795_p3 = scmp.ne.s32.totalorder %s35_s25, %s1794_s12  ;;  %p1800_p5 = scmp.lt.s32.totalorder %s1794_s12, %s1794_s12 }
   0xf   :  { %p1801_p6 = por %p1800_p5, %p1799_p4 }
  0x11   :  { %p1802_p7 = pnand %p1801_p6, %p1795_p3 }
  0x13   :  { %1805 = shalt.err (!%p1802_p7)
}
  0x14   :  { %s1972_s13 = smov 128   ;;  %s1973_s14 = smov 8  }
  0x15   :  { %40 = dma.hbm_to_vmem [thread:$0]  %s2389_s1, 2048, %s35_s25, [#allocation6], %s1972_s13, %s1972_s13, %s1973_s14  }
  0x16   :  { %s1806_s19 = scalar_lea.hbm %s2391_s3, 8192 }
  0x17   :  { %p1807_p8 = scmp.ne.s32.totalorder %s2391_s3, %s1806_s19  ;;  %p1810_p9 = scmp.lt.u32.totalorder %s1806_s19, %s2391_s3 }
  0x19   :  { %p1812_p10 = pnand %p1810_p9, %p1807_p8 }
  0x1b   :  { %1815 = shalt.err (!%p1812_p10)
}
  0x1c   :  { %s1816_s24 = scalar_lea.vmem %s2023_s27, 8192  ;;  %p1821_p12 = scmp.lt.s32.totalorder %s2023_s27, %s2023_s27 }
  0x1d   :  { %p1817_p11 = scmp.ne.s32.totalorder %s2023_s27, %s1816_s24  ;;  %p1822_p13 = scmp.lt.s32.totalorder %s1816_s24, %s1816_s24 }
  0x1f   :  { %p1823_p0 = por %p1822_p13, %p1821_p12 }
  0x21   :  { %p1824_p1 = pnand %p1823_p0, %p1817_p11 }
  0x23   :  { %1827 = shalt.err (!%p1824_p1)
}
  0x24   :  { %s1974_s1 = smov 512   ;;  %s1975_s25 = smov 32  }
  0x25   :  { %62 = dma.hbm_to_vmem [thread:$0]  %s2391_s3, 8192, %s2023_s27, [#allocation9], %s1974_s1, %s1974_s1, %s1975_s25  }
  0x26   :  { %s1976_s29 = smov [#allocation11]   ;;  %s1977_s8 = smov [#allocation2]  }
  0x27   :  { %s78_s30 = sshll.u32 %s1976_s29, 4  ;;  %s22_s9 = sshll.u32 %s1977_s8, 4  ;;  %s79_s30 = int_to_ptr.vmem [resolvable:$true] %s78_s30  ;;  %s2057_s9 = int_to_ptr.vmem [resolvable:$true] %s22_s9 }
  0x28   :  { %s1828_s12 = scalar_lea.hbm %s2393_s5, 8192 }
  0x29   :  { %p1829_p2 = scmp.ne.s32.totalorder %s2393_s5, %s1828_s12  ;;  %p1832_p3 = scmp.lt.u32.totalorder %s1828_s12, %s2393_s5 }
  0x2b   :  { %p1834_p4 = pnand %p1832_p3, %p1829_p2 }
  0x2d   :  { %1837 = shalt.err (!%p1834_p4)
}
  0x2e   :  { %s1838_s3 = scalar_lea.vmem %s79_s30, 8192  ;;  %p1843_p6 = scmp.lt.s32.totalorder %s79_s30, %s79_s30 }
  0x2f   :  { %p1839_p5 = scmp.ne.s32.totalorder %s79_s30, %s1838_s3  ;;  %p1844_p7 = scmp.lt.s32.totalorder %s1838_s3, %s1838_s3 }
  0x31   :  { %p1845_p8 = por %p1844_p7, %p1843_p6 }
  0x33   :  { %p1846_p9 = pnand %p1845_p8, %p1839_p5 }
  0x35   :  { %1849 = shalt.err (!%p1846_p9)
}
  0x36   :  { %84 = dma.hbm_to_vmem [thread:$0]  %s2393_s5, 8192, %s79_s30, [#allocation12], %s1972_s13, %s1972_s13, %s1973_s14  }
  0x37   :  { %s1850_s22 = scalar_lea.hbm %s2388_s0, 2048 }
  0x38   :  { %p1851_p10 = scmp.ne.s32.totalorder %s2388_s0, %s1850_s22  ;;  %p1854_p11 = scmp.lt.u32.totalorder %s1850_s22, %s2388_s0 }
  0x3a   :  { %p1856_p12 = pnand %p1854_p11, %p1851_p10 }
  0x3c   :  { %1859 = shalt.err (!%p1856_p12)
}
  0x3d   :  { %s1860_s26 = scalar_lea.vmem %s2057_s9, 2048  ;;  %p1865_p0 = scmp.lt.s32.totalorder %s2057_s9, %s2057_s9 }
  0x3e   :  { %p1861_p13 = scmp.ne.s32.totalorder %s2057_s9, %s1860_s26  ;;  %p1866_p1 = scmp.lt.s32.totalorder %s1860_s26, %s1860_s26 }
  0x40   :  { %p1867_p2 = por %p1866_p1, %p1865_p0 }
  0x42   :  { %p1868_p3 = pnand %p1867_p2, %p1861_p13 }
  0x44   :  { %1871 = shalt.err (!%p1868_p3)
}
  0x45   :  { %28 = dma.hbm_to_vmem [thread:$0]  %s2388_s0, 2048, %s2057_s9, [#allocation3], %s1972_s13, %s1972_s13, %s1973_s14  }
  0x46   :  { %s1978_s29 = smov [#allocation7]   ;;  %s1979_s8 = smov [#allocation10]  }
  0x47   :  { %s47_s30 = sshll.u32 %s1978_s29, 4  ;;  %s69_s10 = sshll.u32 %s1979_s8, 4  ;;  %s48_s30 = int_to_ptr.vmem [resolvable:$true] %s47_s30  ;;  %s70_s10 = int_to_ptr.vmem [resolvable:$true] %s69_s10 }
  0x48   :  { %s1872_s15 = scalar_lea.hbm %s2390_s2, 16 }
  0x49   :  { %p1873_p4 = scmp.ne.s32.totalorder %s2390_s2, %s1872_s15  ;;  %p1876_p5 = scmp.lt.u32.totalorder %s1872_s15, %s2390_s2 }
  0x4b   :  { %p1878_p6 = pnand %p1876_p5, %p1873_p4 }
  0x4d   :  { %1881 = shalt.err (!%p1878_p6)
}
  0x4e   :  { %s1882_s0 = scalar_lea.vmem %s48_s30, 16  ;;  %s1886_s9 = scalar_lea.vmem %s48_s30, 32 }
  0x4f   :  { %p1883_p7 = scmp.ne.s32.totalorder %s48_s30, %s1882_s0  ;;  %p1887_p8 = scmp.lt.s32.totalorder %s48_s30, %s48_s30 }
  0x50   :  { %p1888_p9 = scmp.lt.s32.totalorder %s1886_s9, %s1882_s0 }
  0x52   :  { %p1889_p10 = por %p1888_p9, %p1887_p8 }
  0x54   :  { %p1890_p11 = pnand %p1889_p10, %p1883_p7 }
  0x56   :  { %1893 = shalt.err (!%p1890_p11)
}
  0x57   :  { %50 = dma.hbm_to_vmem [thread:$0]  %s2390_s2, 16, %s48_s30, [#allocation6]  }
  0x58   :  { %s1894_s22 = scalar_lea.hbm %s2392_s4, 64 }
  0x59   :  { %p1895_p12 = scmp.ne.s32.totalorder %s2392_s4, %s1894_s22  ;;  %p1898_p13 = scmp.lt.u32.totalorder %s1894_s22, %s2392_s4 }
  0x5b   :  { %p1900_p0 = pnand %p1898_p13, %p1895_p12 }
  0x5d   :  { %1903 = shalt.err (!%p1900_p0)
}
  0x5e   :  { %s1904_s26 = scalar_lea.vmem %s70_s10, 64  ;;  %p1909_p2 = scmp.lt.s32.totalorder %s70_s10, %s70_s10 }
  0x5f   :  { %p1905_p1 = scmp.ne.s32.totalorder %s70_s10, %s1904_s26  ;;  %p1910_p3 = scmp.lt.s32.totalorder %s1904_s26, %s1904_s26 }
  0x61   :  { %p1911_p4 = por %p1910_p3, %p1909_p2 }
  0x63   :  { %p1912_p5 = pnand %p1911_p4, %p1905_p1 }
  0x65   :  { %1915 = shalt.err (!%p1912_p5)
}
  0x66   :  { %72 = dma.hbm_to_vmem [thread:$0]  %s2392_s4, 64, %s70_s10, [#allocation9]  }
  0x67   :  { %s1980_s28 = smov [#allocation13]   ;;  %s1916_s11 = scalar_lea.hbm %s2394_s6, 16 }
  0x68   :  { %s91_s29 = sshll.u32 %s1980_s28, 4  ;;  %p1917_p6 = scmp.ne.s32.totalorder %s2394_s6, %s1916_s11  ;;  %s92_s29 = int_to_ptr.vmem [resolvable:$true] %s91_s29 }
  0x69   :  { %p1920_p7 = scmp.lt.u32.totalorder %s1916_s11, %s2394_s6 }
  0x6b   :  { %p1922_p8 = pnand %p1920_p7, %p1917_p6 }
  0x6d   :  { %1925 = shalt.err (!%p1922_p8)
}
  0x6e   :  { %s1926_s18 = scalar_lea.vmem %s92_s29, 16  ;;  %s1930_s4 = scalar_lea.vmem %s92_s29, 32 }
  0x6f   :  { %p1927_p9 = scmp.ne.s32.totalorder %s92_s29, %s1926_s18  ;;  %p1931_p10 = scmp.lt.s32.totalorder %s92_s29, %s92_s29 }
  0x70   :  { %p1932_p11 = scmp.lt.s32.totalorder %s1930_s4, %s1926_s18 }
  0x72   :  { %p1933_p12 = por %p1932_p11, %p1931_p10 }
  0x74   :  { %p1934_p13 = pnand %p1933_p12, %p1927_p9 }
  0x76   :  { %1937 = shalt.err (!%p1934_p13)
}
  0x77   :  { %94 = dma.hbm_to_vmem [thread:$0]  %s2394_s6, 16, %s92_s29, [#allocation12]  }
  0x78   :  { %1960 = dma.done.wait [#allocation3], 2048  }
  0x79   :  { %1961 = vsyncadd [#allocation3], 4294965248 }
  0x7a   :  { %1962 = dma.done.wait [#allocation6], 2064  }
  0x7b   :  { %1963 = vsyncadd [#allocation6], 4294965232 }
  0x7c   :  { %1964 = dma.done.wait [#allocation9], 8256  }
  0x7d   :  { %1965 = vsyncadd [#allocation9], 4294959040 }
  0x7e   :  { %1966 = dma.done.wait [#allocation12], 8208  }
  0x7f   :  { %1967 = vsyncadd [#allocation12], 4294959088  ;;  %v132_v0 = vld [vmem:[#allocation5] sm:$0xff]  ;;  %v133_v1 = vld [vmem:[#allocation5 + $0x8] sm:$0xff]  ;;  %s1982_s6 = smov [#allocation14]  }
  0x80   :  { %v134_v2 = vld [vmem:[#allocation5 + $0x10] sm:$0xff]  ;;  %v1595_v3 = vpack.c.bf16 %v133_v1, %v132_v0  ;;  %v135_v4 = vld [vmem:[#allocation5 + $0x18] sm:$0xff]  ;;  %v136_v6 = vld [vmem:[#allocation5 + $0x20] sm:$0xff]  ;;  %s1330_s0 = sshll.u32 %s1982_s6, 4  ;;  %s1331_s0 = int_to_ptr.vmem [resolvable:$true] %s1330_s0 }
  0x81   :  { %v1599_v5 = vpack.c.bf16 %v135_v4, %v134_v2  ;;  %v137_v7 = vld [vmem:[#allocation5 + $0x28] sm:$0xff]  ;;  %v116_v9 = vld [vmem:[#allocation2] sm:$0xff]  ;;  %v138_v10 = vld [vmem:[#allocation5 + $0x30] sm:$0xff]  ;;  %s1938_s9 = scalar_lea.vmem %s1331_s0, 2048  ;;  %p1943_p1 = scmp.lt.s32.totalorder %s1331_s0, %s1331_s0 }
  0x82   :  { %1596 = vmatprep.subr.bf16.mxu0 %v1595_v3  ;;  %v1603_v8 = vpack.c.bf16 %v137_v7, %v136_v6  ;;  %v139_v11 = vld [vmem:[#allocation5 + $0x38] sm:$0xff]  ;;  %1571 = vmatprep.mubr.f32.mxu0 %v116_v9  ;;  %v140_v13 = vld [vmem:[#allocation5 + $0x40] sm:$0xff]  ;;  %v141_v14 = vld [vmem:[#allocation5 + $0x48] sm:$0xff]  ;;  %p1939_p0 = scmp.ne.s32.totalorder %s1331_s0, %s1938_s9  ;;  %p1944_p2 = scmp.lt.s32.totalorder %s1938_s9, %s1938_s9 }
  0x83   :  { %1598 = vmatpush3.bf16.msra.mxu0 %v1595_v3  ;;  %v1607_v12 = vpack.c.bf16 %v139_v11, %v138_v10  ;;  %v349_v15 = vld [vmem:[#allocation8 + $0x8] sm:$0xff]  ;;  %v348_v18 = vld [vmem:[#allocation8] sm:$0xff]  ;;  %v1611_v20 = vpack.c.bf16 %v141_v14, %v140_v13  ;;  %v143_v25 = vld [vmem:[#allocation5 + $0x58] sm:$0xff] }
  0x84   :  { %1600 = vmatprep.subr.bf16.mxu0 %v1599_v5  ;;  %v353_v16 = vld [vmem:[#allocation8 + $0x28] sm:$0xff]  ;;  %v352_v19 = vld [vmem:[#allocation8 + $0x20] sm:$0xff]  ;;  %v147_v48 = vld [vmem:[#allocation5 + $0x78] sm:$0xff]  ;;  %p1945_p3 = por %p1944_p2, %p1943_p1 }
  0x85   :  { %v1627_v17 = vpack.c.bf16 %v353_v16, %v349_v15  ;;  %v1629_v21 = vpack.c.bf16 %v352_v19, %v348_v18  ;;  %v357_v22 = vld [vmem:[#allocation8 + $0x48] sm:$0xff]  ;;  %v356_v27 = vld [vmem:[#allocation8 + $0x40] sm:$0xff]  ;;  %v351_v56 = vld [vmem:[#allocation8 + $0x18] sm:$0xff] }
  0x86   :  { %v361_v23 = vld [vmem:[#allocation8 + $0x68] sm:$0xff]  ;;  %v360_v28 = vld [vmem:[#allocation8 + $0x60] sm:$0xff]  ;;  %v355_v57 = vld [vmem:[#allocation8 + $0x38] sm:$0xff]  ;;  %p1946_p4 = pnand %p1945_p3, %p1939_p0 }
  0x87   :  { %1602 = vmatpush3.bf16.msra.mxu0 %v1599_v5  ;;  %v142_v24 = vld [vmem:[#allocation5 + $0x50] sm:$0xff]  ;;  %1628 = vmatprep.subr.bf16.mxu1 %v1627_v17  ;;  %v1631_v26 = vpack.c.bf16 %v361_v23, %v357_v22  ;;  %v1633_v29 = vpack.c.bf16 %v360_v28, %v356_v27  ;;  %v364_v34 = vld [vmem:[#allocation8 + $0x80] sm:$0xff]  ;;  %v1659_v62 = vpack.c.bf16 %v355_v57, %v351_v56  ;;  %v359_v1 = vld [vmem:[#allocation8 + $0x58] sm:$0xff] }
  0x88   :  { %1604 = vmatprep.subr.bf16.mxu0 %v1603_v8  ;;  %1630 = vmatpush1.bf16.msra.mxu1 %v1629_v21  ;;  %v365_v30 = vld [vmem:[#allocation8 + $0x88] sm:$0xff]  ;;  %v1615_v32 = vpack.c.bf16 %v143_v25, %v142_v24  ;;  %v368_v35 = vld [vmem:[#allocation8 + $0xa0] sm:$0xff]  ;;  %v350_v63 = vld [vmem:[#allocation8 + $0x10] sm:$0xff] }
  0x89   :  { %1632 = vmatprep.subr.bf16.mxu1 %v1631_v26  ;;  %v369_v31 = vld [vmem:[#allocation8 + $0xa8] sm:$0xff]  ;;  %v144_v36 = vld [vmem:[#allocation5 + $0x60] sm:$0xff]  ;;  %v1637_v39 = vpack.c.bf16 %v368_v35, %v364_v34  ;;  %v354_v0 = vld [vmem:[#allocation8 + $0x30] sm:$0xff] }
  0x8a   :  { %v1635_v33 = vpack.c.bf16 %v369_v31, %v365_v30  ;;  %v145_v37 = vld [vmem:[#allocation5 + $0x68] sm:$0xff]  ;;  %v146_v47 = vld [vmem:[#allocation5 + $0x70] sm:$0xff]  ;;  %v363_v2 = vld [vmem:[#allocation8 + $0x78] sm:$0xff]  ;;  %v1661_v7 = vpack.c.bf16 %v354_v0, %v350_v63 }
  0x8b   :  { %1606 = vmatpush3.bf16.msra.mxu0 %v1603_v8  ;;  %v373_v38 = vld [vmem:[#allocation8 + $0xc8] sm:$0xff]  ;;  %v372_v42 = vld [vmem:[#allocation8 + $0xc0] sm:$0xff]  ;;  %v1619_v44 = vpack.c.bf16 %v145_v37, %v144_v36  ;;  %v1623_v53 = vpack.c.bf16 %v147_v48, %v146_v47  ;;  %v1663_v9 = vpack.c.bf16 %v363_v2, %v359_v1  ;;  %v358_v10 = vld [vmem:[#allocation8 + $0x50] sm:$0xff] }
  0x8c   :  { %1608 = vmatprep.subr.bf16.mxu0 %v1607_v12  ;;  %1634 = vmatpush1.bf16.msra.mxu1 %v1633_v29  ;;  %v377_v40 = vld [vmem:[#allocation8 + $0xe8] sm:$0xff]  ;;  %v376_v43 = vld [vmem:[#allocation8 + $0xe0] sm:$0xff]  ;;  %v362_v11 = vld [vmem:[#allocation8 + $0x70] sm:$0xff] }
  0x8d   :  { %1636 = vmatprep.subr.bf16.mxu1 %v1635_v33  ;;  %v1639_v41 = vpack.c.bf16 %v377_v40, %v373_v38  ;;  %v381_v45 = vld [vmem:[#allocation8 + $0x108] sm:$0xff]  ;;  %v1641_v49 = vpack.c.bf16 %v376_v43, %v372_v42  ;;  %v380_v51 = vld [vmem:[#allocation8 + $0x100] sm:$0xff]  ;;  %v367_v13 = vld [vmem:[#allocation8 + $0x98] sm:$0xff]  ;;  %v1665_v16 = vpack.c.bf16 %v362_v11, %v358_v10 }
  0x8e   :  { %v385_v46 = vld [vmem:[#allocation8 + $0x128] sm:$0xff]  ;;  %v384_v52 = vld [vmem:[#allocation8 + $0x120] sm:$0xff]  ;;  %v371_v14 = vld [vmem:[#allocation8 + $0xb8] sm:$0xff] }
  0x8f   :  { %1610 = vmatpush3.bf16.msra.mxu0 %v1607_v12  ;;  %v1643_v50 = vpack.c.bf16 %v385_v46, %v381_v45  ;;  %v389_v54 = vld [vmem:[#allocation8 + $0x148] sm:$0xff]  ;;  %v1645_v58 = vpack.c.bf16 %v384_v52, %v380_v51  ;;  %v388_v60 = vld [vmem:[#allocation8 + $0x140] sm:$0xff]  ;;  %v119_v15 = vld [vmem:[#allocation2 + $0x18] sm:$0xff]  ;;  %v1667_v18 = vpack.c.bf16 %v371_v14, %v367_v13 }
  0x90   :  { %1612 = vmatprep.subr.bf16.mxu0 %v1611_v20  ;;  %1638 = vmatpush1.bf16.msra.mxu1 %v1637_v39  ;;  %v393_v55 = vld [vmem:[#allocation8 + $0x168] sm:$0xff]  ;;  %v392_v61 = vld [vmem:[#allocation8 + $0x160] sm:$0xff]  ;;  %v366_v19 = vld [vmem:[#allocation8 + $0x90] sm:$0xff] }
  0x91   :  { %1640 = vmatprep.subr.bf16.mxu1 %v1639_v41  ;;  %v1647_v59 = vpack.c.bf16 %v393_v55, %v389_v54  ;;  %v397_v3 = vld [vmem:[#allocation8 + $0x188] sm:$0xff]  ;;  %v1649_v5 = vpack.c.bf16 %v392_v61, %v388_v60  ;;  %v120_v17 = vld [vmem:[#allocation2 + $0x20] sm:$0xff]  ;;  %v374_v27 = vld [vmem:[#allocation8 + $0xd0] sm:$0xff] }
  0x92   :  { %v401_v4 = vld [vmem:[#allocation8 + $0x1a8] sm:$0xff]  ;;  %v375_v21 = vld [vmem:[#allocation8 + $0xd8] sm:$0xff]  ;;  %v378_v28 = vld [vmem:[#allocation8 + $0xf0] sm:$0xff] }
  0x93   :  { %1614 = vmatpush3.bf16.msra.mxu0 %v1611_v20  ;;  %v117_v6 = vld [vmem:[#allocation2 + $0x8] sm:$0xff]  ;;  %v118_v8 = vld [vmem:[#allocation2 + $0x10] sm:$0xff]  ;;  %v1651_v12 = vpack.c.bf16 %v401_v4, %v397_v3  ;;  %v379_v22 = vld [vmem:[#allocation8 + $0xf8] sm:$0xff] }
  0x94   :  { %1616 = vmatprep.subr.bf16.mxu0 %v1615_v32  ;;  %1642 = vmatpush1.bf16.msra.mxu1 %v1641_v49  ;;  %v370_v20 = vld [vmem:[#allocation8 + $0xb0] sm:$0xff]  ;;  %v121_v23 = vld [vmem:[#allocation2 + $0x28] sm:$0xff]  ;;  %v1671_v26 = vpack.c.bf16 %v379_v22, %v375_v21  ;;  %v383_v29 = vld [vmem:[#allocation8 + $0x118] sm:$0xff] }
  0x95   :  { %1644 = vmatprep.subr.bf16.mxu1 %v1643_v50  ;;  %v1669_v24 = vpack.c.bf16 %v370_v20, %v366_v19  ;;  %v122_v25 = vld [vmem:[#allocation2 + $0x30] sm:$0xff]  ;;  %v387_v30 = vld [vmem:[#allocation8 + $0x138] sm:$0xff]  ;;  %v125_v39 = vld [vmem:[#allocation2 + $0x48] sm:$0xff] }
  0x96   :  { %v123_v31 = vld [vmem:[#allocation2 + $0x38] sm:$0xff]  ;;  %v124_v33 = vld [vmem:[#allocation2 + $0x40] sm:$0xff]  ;;  %v1675_v34 = vpack.c.bf16 %v387_v30, %v383_v29  ;;  %v126_v41 = vld [vmem:[#allocation2 + $0x50] sm:$0xff] }
  0x97   :  { %1618 = vmatpush3.bf16.msra.mxu0 %v1615_v32  ;;  %v1673_v32 = vpack.c.bf16 %v378_v28, %v374_v27  ;;  %v382_v35 = vld [vmem:[#allocation8 + $0x110] sm:$0xff]  ;;  %v391_v37 = vld [vmem:[#allocation8 + $0x158] sm:$0xff]  ;;  %v129_v51 = vld [vmem:[#allocation2 + $0x68] sm:$0xff] }
  0x98   :  { %1620 = vmatprep.subr.bf16.mxu0 %v1619_v44  ;;  %1646 = vmatpush1.bf16.msra.mxu1 %v1645_v58  ;;  %v386_v36 = vld [vmem:[#allocation8 + $0x130] sm:$0xff]  ;;  %v395_v38 = vld [vmem:[#allocation8 + $0x178] sm:$0xff]  ;;  %v396_v54 = vld [vmem:[#allocation8 + $0x180] sm:$0xff] }
  0x99   :  { %1648 = vmatprep.subr.bf16.mxu1 %v1647_v59  ;;  %v1677_v40 = vpack.c.bf16 %v386_v36, %v382_v35  ;;  %v1679_v42 = vpack.c.bf16 %v395_v38, %v391_v37  ;;  %v390_v43 = vld [vmem:[#allocation8 + $0x150] sm:$0xff]  ;;  %v399_v45 = vld [vmem:[#allocation8 + $0x198] sm:$0xff]  ;;  %v400_v55 = vld [vmem:[#allocation8 + $0x1a0] sm:$0xff] }
  0x9a   :  { %v403_v46 = vld [vmem:[#allocation8 + $0x1b8] sm:$0xff]  ;;  %v130_v52 = vld [vmem:[#allocation2 + $0x70] sm:$0xff]  ;;  %v1653_v57 = vpack.c.bf16 %v400_v55, %v396_v54  ;;  %v404_v1 = vld [vmem:[#allocation8 + $0x1c0] sm:$0xff] }
  0x9b   :  { %1622 = vmatpush3.bf16.msra.mxu0 %v1619_v44  ;;  %v394_v44 = vld [vmem:[#allocation8 + $0x170] sm:$0xff]  ;;  %v128_v49 = vld [vmem:[#allocation2 + $0x60] sm:$0xff]  ;;  %v1683_v50 = vpack.c.bf16 %v403_v46, %v399_v45  ;;  %v405_v60 = vld [vmem:[#allocation8 + $0x1c8] sm:$0xff] }
  0x9c   :  { %1624 = vmatprep.subr.bf16.mxu0 %v1623_v53  ;;  %1650 = vmatpush1.bf16.msra.mxu1 %v1649_v5  ;;  %v127_v47 = vld [vmem:[#allocation2 + $0x58] sm:$0xff]  ;;  %v1681_v48 = vpack.c.bf16 %v394_v44, %v390_v43  ;;  %v409_v61 = vld [vmem:[#allocation8 + $0x1e8] sm:$0xff]  ;;  %v408_v3 = vld [vmem:[#allocation8 + $0x1e0] sm:$0xff] }
  0x9d   :  { %1652 = vmatprep.subr.bf16.mxu1 %v1651_v12  ;;  %v398_v56 = vld [vmem:[#allocation8 + $0x190] sm:$0xff]  ;;  %v407_v63 = vld [vmem:[#allocation8 + $0x1d8] sm:$0xff]  ;;  %v996_v12 = vld [vmem:[#allocation11 + $0x180] sm:$0xff] }
  0x9e   :  { %v402_v58 = vld [vmem:[#allocation8 + $0x1b0] sm:$0xff]  ;;  %v411_v0 = vld [vmem:[#allocation8 + $0x1f8] sm:$0xff]  ;;  %v968_v35 = vld [vmem:[#allocation11 + $0xa0] sm:$0xff] }
  0x9f   :  { %1626 = vmatpush3.bf16.msra.mxu0 %v1623_v53  ;;  %v131_v53 = vld [vmem:[#allocation2 + $0x78] sm:$0xff]  ;;  %v1685_v59 = vpack.c.bf16 %v402_v58, %v398_v56  ;;  %v1687_v2 = vpack.c.bf16 %v411_v0, %v407_v63  ;;  %v965_v10 = vld [vmem:[#allocation11 + $0x88] sm:$0xff]  ;;  %v1000_v44 = vld [vmem:[#allocation11 + $0x1a0] sm:$0xff] }
  0xa0   :  { %1660 = vmatprep.subr.bf16.mxu0 %v1659_v62  ;;  %1654 = vmatpush1.bf16.msra.mxu1 %v1653_v57  ;;  %v1655_v62 = vpack.c.bf16 %v409_v61, %v405_v60  ;;  %v406_v4 = vld [vmem:[#allocation8 + $0x1d0] sm:$0xff]  ;;  %v999_v27 = vld [vmem:[#allocation11 + $0x198] sm:$0xff] }
  0xa1   :  { %v410_v5 = vld [vmem:[#allocation8 + $0x1f0] sm:$0xff]  ;;  %v983_v43 = vld [vmem:[#allocation11 + $0x118] sm:$0xff] }
  0xa2   :  { %1572 = vmatmul.mubr.f32.vlgmr.msra.gmra.mrb[0].mxu0 %v117_v6  ;;  %1656 = vmatprep.subr.bf16.mxu1 %v1655_v62  ;;  %v1657_v6 = vpack.c.bf16 %v408_v3, %v404_v1  ;;  %v997_v13 = vld [vmem:[#allocation11 + $0x188] sm:$0xff]  ;;  %v966_v20 = vld [vmem:[#allocation11 + $0x90] sm:$0xff]  ;;  %v971_v57 = vld [vmem:[#allocation11 + $0xb8] sm:$0xff] }
  0xa3   :  { %1574 = vmatprep.mubr.f32.mxu0 %v118_v8  ;;  %1662 = vmatpush1.bf16.msra.mxu0 %v1661_v7  ;;  %v1689_v7 = vpack.c.bf16 %v410_v5, %v406_v4  ;;  %v1981_v8 = vmov 0.0   ;;  %v2132_v14 = vpack.c.bf16 %v997_v13, %v996_v12  ;;  %v949_v19 = vld [vmem:[#allocation11 + $0x8] sm:$0xff]  ;;  %v1002_v61 = vld [vmem:[#allocation11 + $0x1b0] sm:$0xff]  ;;  %v1003_v62 = vld [vmem:[#allocation11 + $0x1b8] sm:$0xff] }
  0xa4   :  { %1664 = vmatprep.subr.bf16.mxu0 %v1663_v9  ;;  %1658 = vmatpush1.bf16.msra.mxu1 %v1657_v6  ;;  %v964_v9 = vld [vmem:[#allocation11 + $0x80] sm:$0xff]  ;;  %v1001_v45 = vld [vmem:[#allocation11 + $0x1a8] sm:$0xff]  ;;  %v954_v3 = vld [vmem:[#allocation11 + $0x30] sm:$0xff]  ;;  %v2164_v12 = vpack.c.bf16 %v1003_v62, %v1002_v61 }
  0xa5   :  { %498 = vmatprep.mubr.f32.mxu1 %v1981_v8  ;;  %v1691_v11 = vpack.c.bf16 %v965_v10, %v964_v9  ;;  %v2152_v58 = vpack.c.bf16 %v1001_v45, %v1000_v44  ;;  %v985_v60 = vld [vmem:[#allocation11 + $0x128] sm:$0xff]  ;;  %v955_v4 = vld [vmem:[#allocation11 + $0x38] sm:$0xff]  ;;  %v972_v5 = vld [vmem:[#allocation11 + $0xc0] sm:$0xff] }
  0xa6   :  { %1575 = vmatmul.mubr.f32.gmra.mrb[2].mxu0 %v119_v15  ;;  %v2135_v15 = vld [vmem:[#allocation7] ss:$0 sm:$0xff]  ;;  %v986_v13 = vld [vmem:[#allocation11 + $0x130] sm:$0xff] }
  0xa7   :  { %1577 = vmatprep.mubr.f32.mxu0 %v120_v17  ;;  %1666 = vmatpush1.bf16.msra.mxu0 %v1665_v16 }
  0xa8   :  { %1668 = vmatprep.subr.bf16.mxu0 %v1667_v18  ;;  %1692 = vmatprep.subr.bf16.mxu1 %v1691_v11  ;;  %v948_v18 = vld [vmem:[#allocation11] sm:$0xff]  ;;  %v973_v11 = vld [vmem:[#allocation11 + $0xc8] sm:$0xff] }
  0xaa   :  { %1578 = vmatmul.mubr.f32.gmra.mrb[4].mxu0 %v121_v23  ;;  %v967_v23 = vld [vmem:[#allocation11 + $0x98] sm:$0xff] }
  0xab   :  { %1580 = vmatprep.mubr.f32.mxu0 %v122_v25  ;;  %1670 = vmatpush1.bf16.msra.mxu0 %v1669_v24  ;;  %v980_v24 = vld [vmem:[#allocation11 + $0x100] sm:$0xff]  ;;  %v981_v25 = vld [vmem:[#allocation11 + $0x108] sm:$0xff] }
  0xac   :  { %1672 = vmatprep.subr.bf16.mxu0 %v1671_v26  ;;  %v998_v26 = vld [vmem:[#allocation11 + $0x190] sm:$0xff]  ;;  %v2139_v36 = vpack.c.bf16 %v981_v25, %v980_v24  ;;  %v957_v24 = vld [vmem:[#allocation11 + $0x48] sm:$0xff] }
  0xad   :  { %v974_v25 = vld [vmem:[#allocation11 + $0xd0] sm:$0xff] }
  0xae   :  { %1581 = vmatmul.mubr.f32.gmra.mrb[6].mxu0 %v123_v31  ;;  %v1693_v31 = vpack.c.bf16 %v949_v19, %v948_v18  ;;  %v1005_v18 = vld [vmem:[#allocation11 + $0x1c8] sm:$0xff] }
  0xaf   :  { %1583 = vmatprep.mubr.f32.mxu0 %v124_v33  ;;  %1674 = vmatpush1.bf16.msra.mxu0 %v1673_v32  ;;  %v1695_v32 = vpack.c.bf16 %v967_v23, %v966_v20  ;;  %v950_v33 = vld [vmem:[#allocation11 + $0x10] sm:$0xff]  ;;  %v956_v23 = vld [vmem:[#allocation11 + $0x40] sm:$0xff] }
  0xb0   :  { %1676 = vmatprep.subr.bf16.mxu0 %v1675_v34  ;;  %v951_v34 = vld [vmem:[#allocation11 + $0x18] sm:$0xff] }
  0xb2   :  { %1584 = vmatmul.mubr.f32.gmra.mrb[8].mxu0 %v125_v39 }
  0xb3   :  { %1586 = vmatprep.mubr.f32.mxu0 %v126_v41  ;;  %1678 = vmatpush1.bf16.msra.mxu0 %v1677_v40  ;;  %v969_v40 = vld [vmem:[#allocation11 + $0xa8] sm:$0xff]  ;;  %v2142_v41 = vpack.c.bf16 %v999_v27, %v998_v26 }
  0xb4   :  { %1680 = vmatprep.subr.bf16.mxu0 %v1679_v42  ;;  %v982_v42 = vld [vmem:[#allocation11 + $0x110] sm:$0xff] }
  0xb6   :  { %1587 = vmatmul.mubr.f32.gmra.mrb[10].mxu0 %v127_v47 }
  0xb7   :  { %1589 = vmatprep.mubr.f32.mxu0 %v128_v49  ;;  %1682 = vmatpush1.bf16.msra.mxu0 %v1681_v48  ;;  %v1697_v48 = vpack.c.bf16 %v951_v34, %v950_v33  ;;  %v1699_v49 = vpack.c.bf16 %v969_v40, %v968_v35  ;;  %v989_v33 = vld [vmem:[#allocation11 + $0x148] sm:$0xff]  ;;  %v1006_v34 = vld [vmem:[#allocation11 + $0x1d0] sm:$0xff]  ;;  %v1007_v35 = vld [vmem:[#allocation11 + $0x1d8] sm:$0xff] }
  0xb8   :  { %1684 = vmatprep.subr.bf16.mxu0 %v1683_v50  ;;  %v952_v50 = vld [vmem:[#allocation11 + $0x20] sm:$0xff] }
  0xba   :  { %1590 = vmatmul.mubr.f32.gmra.mrb[12].mxu0 %v129_v51  ;;  %v953_v51 = vld [vmem:[#allocation11 + $0x28] sm:$0xff] }
  0xbb   :  { %1592 = vmatprep.mubr.f32.mxu0 %v130_v52  ;;  %1686 = vmatpush1.bf16.msra.mxu0 %v1685_v59  ;;  %v970_v52 = vld [vmem:[#allocation11 + $0xb0] sm:$0xff]  ;;  %v984_v59 = vld [vmem:[#allocation11 + $0x120] sm:$0xff]  ;;  %v1701_v1 = vpack.c.bf16 %v953_v51, %v952_v50  ;;  %v991_v50 = vld [vmem:[#allocation11 + $0x158] sm:$0xff] }
  0xbc   :  { %1688 = vmatprep.subr.bf16.mxu0 %v1687_v2  ;;  %v1703_v2 = vpack.c.bf16 %v971_v57, %v970_v52  ;;  %v2159_v6 = vpack.c.bf16 %v985_v60, %v984_v59  ;;  %v976_v51 = vld [vmem:[#allocation11 + $0xe0] sm:$0xff]  ;;  %v977_v52 = vld [vmem:[#allocation11 + $0xe8] sm:$0xff] }
  0xbd   :  { %v1715_v62 = vpack.c.bf16 %v977_v52, %v976_v51  ;;  %v1011_v51 = vld [vmem:[#allocation11 + $0x1f8] sm:$0xff]  ;;  %v962_v52 = vld [vmem:[#allocation11 + $0x70] sm:$0xff] }
  0xbe   :  { %1593 = vmatmul.mubr.f32.gmra.mrb[14].mxu0 %v131_v53  ;;  %v2147_v53 = vpack.c.bf16 %v983_v43, %v982_v42  ;;  %v958_v42 = vld [vmem:[#allocation11 + $0x50] sm:$0xff] }
  0xbf   :  { %1690 = vmatpush1.bf16.msra.mxu0 %v1689_v7  ;;  %659 = vmatprep.mubr.f32.mxu0 %v1981_v8 }
  0xc0   :  { %1724 = vmatprep.subr.bf16.mxu0 %v2132_v14 }
 0x175   :  { %v1573_v16 = vpop.f32.mrb[0].mxu0 }
 0x176   :  { %v221_v17 = vpop.f32.mrb[1].mxu0  ;;  %v227_v21 = vadd.f32 %v1573_v16, %v2135_v15  ;;  %v987_v16 = vld [vmem:[#allocation11 + $0x138] sm:$0xff] }
 0x177   :  { %v222_v22 = vadd.f32 %v2135_v15, %v221_v17  ;;  %v1004_v17 = vld [vmem:[#allocation11 + $0x1c0] sm:$0xff]  ;;  %v2173_v26 = vpack.c.bf16 %v987_v16, %v986_v13 }
 0x178   :  { %v317_v37 = vmul.f32 0.2, %v227_v21  ;;  %vm301_vm1 = vcmp.gt.f32.partialorder %v227_v21, 0.0 }
 0x179   :  { %v316_v28 = vmul.f32 0.2, %v222_v22  ;;  %v1576_v29 = vpop.f32.mrb[2].mxu0  ;;  %vm300_vm0 = vcmp.gt.f32.partialorder %v222_v22, 0.0 }
 0x17a   :  { %v231_v30 = vpop.f32.mrb[3].mxu0  ;;  %v237_v54 = vadd.f32 %v1576_v29, %v2135_v15  ;;  %v333_v56 = vsel %vm301_vm1, %v227_v21, %v317_v37  ;;  %v1705_v21 = vpack.c.bf16 %v955_v4, %v954_v3  ;;  %v979_v3 = vld [vmem:[#allocation11 + $0xf8] sm:$0xff] }
 0x17b   :  { %v232_v38 = vadd.f32 %v2135_v15, %v231_v30  ;;  %v332_v39 = vsel %vm300_vm0, %v222_v22, %v316_v28  ;;  %v1707_v22 = vpack.c.bf16 %v973_v11, %v972_v5  ;;  %v975_v30 = vld [vmem:[#allocation11 + $0xd8] sm:$0xff] }
 0x17c   :  { %499 = vmatmul.mubr.f32.vlgmr.msra.gmra.mrb[0].mxu1 %v332_v39  ;;  %660 = vmatmul.mubr.f32.vlgmr.msra.gmra.mrb[16].mxu0 %v332_v39  ;;  %v319_v7 = vmul.f32 0.2, %v237_v54  ;;  %vm303_vm3 = vcmp.gt.f32.partialorder %v237_v54, 0.0  ;;  %v1709_v39 = vpack.c.bf16 %v957_v24, %v956_v23  ;;  %v1711_v40 = vpack.c.bf16 %v975_v30, %v974_v25 }
 0x17d   :  { %504 = vmatprep.mubr.f32.mxu1 %v1981_v8  ;;  %665 = vmatprep.mubr.f32.mxu0 %v1981_v8  ;;  %v1579_v46 = vpop.f32.mrb[4].mxu0  ;;  %v318_v55 = vmul.f32 0.2, %v232_v38  ;;  %vm302_vm2 = vcmp.gt.f32.partialorder %v232_v38, 0.0 }
 0x17e   :  { %v241_v47 = vpop.f32.mrb[5].mxu0  ;;  %1694 = vmatpush3.bf16.msra.mxu1 %v1693_v31  ;;  %1726 = vmatpush3.bf16.msra.mxu0 %v2139_v36  ;;  %v247_v27 = vadd.f32 %v1579_v46, %v2135_v15  ;;  %v335_v29 = vsel %vm303_vm3, %v237_v54, %v319_v7  ;;  %v2178_v31 = vpack.c.bf16 %v1005_v18, %v1004_v17 }
 0x17f   :  { %1696 = vmatprep.subr.bf16.mxu1 %v1695_v32  ;;  %1728 = vmatprep.subr.bf16.mxu0 %v2142_v41  ;;  %v242_v9 = vadd.f32 %v2135_v15, %v241_v47  ;;  %v334_v10 = vsel %vm302_vm2, %v232_v38, %v318_v55  ;;  %v988_v32 = vld [vmem:[#allocation11 + $0x140] sm:$0xff]  ;;  %v959_v47 = vld [vmem:[#allocation11 + $0x58] sm:$0xff] }
 0x180   :  { %505 = vmatmul.mubr.f32.gmra.mrb[2].mxu1 %v333_v56  ;;  %666 = vmatmul.mubr.f32.gmra.mrb[18].mxu0 %v333_v56  ;;  %v2187_v43 = vpack.c.bf16 %v989_v33, %v988_v32  ;;  %v321_v44 = vmul.f32 0.2, %v247_v27  ;;  %vm305_vm5 = vcmp.gt.f32.partialorder %v247_v27, 0.0  ;;  %v1713_v56 = vpack.c.bf16 %v959_v47, %v958_v42  ;;  %v993_v47 = vld [vmem:[#allocation11 + $0x168] sm:$0xff] }
 0x181   :  { %510 = vmatprep.mubr.f32.mxu1 %v1981_v8  ;;  %671 = vmatprep.mubr.f32.mxu0 %v1981_v8  ;;  %v2156_v63 = vpop.f32.mrb[6].mxu0  ;;  %v320_v28 = vmul.f32 0.2, %v242_v9  ;;  %vm304_vm4 = vcmp.gt.f32.partialorder %v242_v9, 0.0 }
 0x182   :  { %v251_v0 = vpop.f32.mrb[7].mxu0  ;;  %1698 = vmatpush3.bf16.msra.mxu1 %v1697_v48  ;;  %1730 = vmatpush3.bf16.msra.mxu0 %v2147_v53  ;;  %v2191_v48 = vpack.c.bf16 %v1007_v35, %v1006_v34  ;;  %v257_v59 = vadd.f32 %v2156_v63, %v2135_v15  ;;  %v337_v61 = vsel %vm305_vm5, %v247_v27, %v321_v44  ;;  %v1009_v44 = vld [vmem:[#allocation11 + $0x1e8] sm:$0xff] }
 0x183   :  { %1700 = vmatprep.subr.bf16.mxu1 %v1699_v49  ;;  %1732 = vmatprep.subr.bf16.mxu0 %v2152_v58  ;;  %v252_v45 = vadd.f32 %v2135_v15, %v251_v0  ;;  %v336_v46 = vsel %vm304_vm4, %v242_v9, %v320_v28  ;;  %v990_v49 = vld [vmem:[#allocation11 + $0x150] sm:$0xff]  ;;  %v960_v0 = vld [vmem:[#allocation11 + $0x60] sm:$0xff] }
 0x184   :  { %511 = vmatmul.mubr.f32.gmra.mrb[4].mxu1 %v334_v10  ;;  %672 = vmatmul.mubr.f32.gmra.mrb[20].mxu0 %v334_v10  ;;  %v2198_v57 = vpack.c.bf16 %v991_v50, %v990_v49  ;;  %v323_v7 = vmul.f32 0.2, %v257_v59  ;;  %vm307_vm7 = vcmp.gt.f32.partialorder %v257_v59, 0.0  ;;  %v1010_v50 = vld [vmem:[#allocation11 + $0x1f0] sm:$0xff] }
 0x185   :  { %516 = vmatprep.mubr.f32.mxu1 %v1981_v8  ;;  %677 = vmatprep.mubr.f32.mxu0 %v1981_v8  ;;  %v2168_v19 = vpop.f32.mrb[8].mxu0  ;;  %v322_v60 = vmul.f32 0.2, %v252_v45  ;;  %vm306_vm6 = vcmp.gt.f32.partialorder %v252_v45, 0.0 }
 0x186   :  { %v2170_v20 = vpop.f32.mrb[9].mxu0  ;;  %1702 = vmatpush3.bf16.msra.mxu1 %v1701_v1  ;;  %1734 = vmatpush3.bf16.msra.mxu0 %v2159_v6  ;;  %v961_v1 = vld [vmem:[#allocation11 + $0x68] sm:$0xff]  ;;  %v267_v13 = vadd.f32 %v2168_v19, %v2135_v15  ;;  %v339_v17 = vsel %vm307_vm7, %v257_v59, %v323_v7  ;;  %v995_v59 = vld [vmem:[#allocation11 + $0x178] sm:$0xff] }
 0x187   :  { %1704 = vmatprep.subr.bf16.mxu1 %v1703_v2  ;;  %1736 = vmatprep.subr.bf16.mxu0 %v2164_v12  ;;  %v978_v2 = vld [vmem:[#allocation11 + $0xf0] sm:$0xff]  ;;  %v1717_v5 = vpack.c.bf16 %v961_v1, %v960_v0  ;;  %v262_v9 = vadd.f32 %v2135_v15, %v2170_v20  ;;  %v338_v10 = vsel %vm306_vm6, %v252_v45, %v322_v60 }
 0x188   :  { %517 = vmatmul.mubr.f32.gmra.mrb[6].mxu1 %v335_v29  ;;  %678 = vmatmul.mubr.f32.gmra.mrb[22].mxu0 %v335_v29  ;;  %v1719_v11 = vpack.c.bf16 %v979_v3, %v978_v2  ;;  %v325_v18 = vmul.f32 0.2, %v267_v13  ;;  %vm309_vm9 = vcmp.gt.f32.partialorder %v267_v13, 0.0  ;;  %v412_v2 = vld [vmem:[#allocation10] sm:$0xf] }
 0x189   :  { %522 = vmatprep.mubr.f32.mxu1 %v1981_v8  ;;  %683 = vmatprep.mubr.f32.mxu0 %v1981_v8  ;;  %v2182_v37 = vpop.f32.mrb[10].mxu0  ;;  %v324_v16 = vmul.f32 0.2, %v262_v9  ;;  %vm308_vm8 = vcmp.gt.f32.partialorder %v262_v9, 0.0 }
 0x18a   :  { %v2184_v38 = vpop.f32.mrb[11].mxu0  ;;  %1706 = vmatpush3.bf16.msra.mxu1 %v1705_v21  ;;  %1738 = vmatpush3.bf16.msra.mxu0 %v2173_v26  ;;  %v277_v19 = vadd.f32 %v2182_v37, %v2135_v15  ;;  %v341_v23 = vsel %vm309_vm9, %v267_v13, %v325_v18 }
 0x18b   :  { %1708 = vmatprep.subr.bf16.mxu1 %v1707_v22  ;;  %1740 = vmatprep.subr.bf16.mxu0 %v2178_v31  ;;  %v272_v20 = vadd.f32 %v2135_v15, %v2184_v38  ;;  %v340_v21 = vsel %vm308_vm8, %v262_v9, %v324_v16 }
 0x18c   :  { %523 = vmatmul.mubr.f32.gmra.mrb[8].mxu1 %v336_v46  ;;  %684 = vmatmul.mubr.f32.gmra.mrb[24].mxu0 %v336_v46  ;;  %v327_v24 = vmul.f32 0.2, %v277_v19  ;;  %vm311_vm11 = vcmp.gt.f32.partialorder %v277_v19, 0.0  ;;  %v992_v46 = vld [vmem:[#allocation11 + $0x160] sm:$0xff] }
 0x18d   :  { %528 = vmatprep.mubr.f32.mxu1 %v1981_v8  ;;  %689 = vmatprep.mubr.f32.mxu0 %v1981_v8  ;;  %v2195_v54 = vpop.f32.mrb[12].mxu0  ;;  %v326_v22 = vmul.f32 0.2, %v272_v20  ;;  %vm310_vm10 = vcmp.gt.f32.partialorder %v272_v20, 0.0  ;;  %v2242_v49 = vpack.c.bf16 %v993_v47, %v992_v46 }
 0x18e   :  { %v281_v55 = vpop.f32.mrb[13].mxu0  ;;  %1710 = vmatpush3.bf16.msra.mxu1 %v1709_v39  ;;  %1742 = vmatpush3.bf16.msra.mxu0 %v2187_v43  ;;  %v287_v28 = vadd.f32 %v2195_v54, %v2135_v15  ;;  %v343_v30 = vsel %vm311_vm11, %v277_v19, %v327_v24  ;;  %v963_v54 = vld [vmem:[#allocation11 + $0x78] sm:$0xff] }
 0x18f   :  { %1712 = vmatprep.subr.bf16.mxu1 %v1711_v40  ;;  %1744 = vmatprep.subr.bf16.mxu0 %v2191_v48  ;;  %v282_v25 = vadd.f32 %v2135_v15, %v281_v55  ;;  %v342_v27 = vsel %vm310_vm10, %v272_v20, %v326_v22  ;;  %v994_v55 = vld [vmem:[#allocation11 + $0x170] sm:$0xff] }
 0x190   :  { %529 = vmatmul.mubr.f32.gmra.mrb[10].mxu1 %v337_v61  ;;  %690 = vmatmul.mubr.f32.gmra.mrb[26].mxu0 %v337_v61  ;;  %v329_v32 = vmul.f32 0.2, %v287_v28  ;;  %vm313_vm13 = vcmp.gt.f32.partialorder %v287_v28, 0.0  ;;  %v2249_v60 = vpack.c.bf16 %v995_v59, %v994_v55  ;;  %v414_v61 = vlaneseq }
 0x191   :  { %534 = vmatprep.mubr.f32.mxu1 %v1981_v8  ;;  %695 = vmatprep.mubr.f32.mxu0 %v1981_v8  ;;  %v2205_v4 = vpop.f32.mrb[14].mxu0  ;;  %v328_v29 = vmul.f32 0.2, %v282_v25  ;;  %vm312_vm12 = vcmp.gt.f32.partialorder %v282_v25, 0.0 }
 0x192   :  { %v291_v63 = vpop.f32.mrb[15].mxu0  ;;  %1714 = vmatpush3.bf16.msra.mxu1 %v1713_v56  ;;  %1746 = vmatpush3.bf16.msra.mxu0 %v2198_v57  ;;  %v297_v35 = vadd.f32 %v2205_v4, %v2135_v15  ;;  %v345_v38 = vsel %vm313_vm13, %v287_v28, %v329_v32  ;;  %v1721_v56 = vpack.c.bf16 %v963_v54, %v962_v52 }
 0x193   :  { %1716 = vmatprep.subr.bf16.mxu1 %v1715_v62  ;;  %v292_v33 = vadd.f32 %v2135_v15, %v291_v63  ;;  %v344_v34 = vsel %vm312_vm12, %v282_v25, %v328_v29  ;;  %v1008_v15 = vld [vmem:[#allocation11 + $0x1e0] sm:$0xff]  ;;  %v415_v62 = vshrl.u32 %v414_v61, 7 }
 0x194   :  { %535 = vmatmul.mubr.f32.gmra.mrb[12].mxu1 %v338_v10  ;;  %696 = vmatmul.mubr.f32.gmra.mrb[28].mxu0 %v338_v10  ;;  %v331_v39 = vmul.f32 0.2, %v297_v35  ;;  %vm315_vm15 = vcmp.gt.f32.partialorder %v297_v35, 0.0  ;;  %v2240_v45 = vpack.c.bf16 %v1009_v44, %v1008_v15 }
 0x195   :  { %540 = vmatprep.mubr.f32.mxu1 %v1981_v8  ;;  %701 = vmatprep.mubr.f32.mxu0 %v1981_v8  ;;  %v330_v37 = vmul.f32 0.2, %v292_v33  ;;  %vm314_vm14 = vcmp.gt.f32.partialorder %v292_v33, 0.0  ;;  %v416_v0 = vsub.s32 0, %v415_v62  ;;  %v424_v1 = vsub.s32 2, %v415_v62 }
 0x196   :  { %1718 = vmatpush3.bf16.msra.mxu1 %v1717_v5  ;;  %v347_v42 = vsel %vm315_vm15, %v297_v35, %v331_v39  ;;  %1748 = vmatprep.subr.bf16.mxu0 %v2240_v45  ;;  %v420_v3 = vsub.s32 1, %v415_v62  ;;  %v428_v4 = vsub.s32 3, %v415_v62 }
 0x197   :  { %1720 = vmatprep.subr.bf16.mxu1 %v1719_v11  ;;  %v346_v40 = vsel %vm314_vm14, %v292_v33, %v330_v37  ;;  %1750 = vmatpush3.bf16.msra.mxu0 %v2242_v49  ;;  %v2253_v63 = vrot.slane %v412_v2, %v416_v0  ;;  %v2255_v5 = vrot.slane %v412_v2, %v424_v1 }
 0x198   :  { %541 = vmatmul.mubr.f32.gmra.mrb[14].mxu1 %v339_v17  ;;  %702 = vmatmul.mubr.f32.gmra.mrb[30].mxu0 %v339_v17  ;;  %v2257_v7 = vrot.slane %v412_v2, %v420_v3  ;;  %v2259_v9 = vrot.slane %v412_v2, %v428_v4 }
 0x199   :  { %546 = vmatprep.mubr.f32.mxu1 %v1981_v8  ;;  %707 = vmatprep.mubr.f32.mxu0 %v1981_v8 }
 0x19a   :  { %1722 = vmatpush3.bf16.msra.mxu1 %v1721_v56 }
 0x19b   :  { %1755 = vmatprep.subr.bf16.mxu1 %v2132_v14 }
 0x19c   :  { %547 = vmatmul.mubr.f32.gmra.mrb[16].mxu1 %v340_v21  ;;  %708 = vmatmul.mubr.f32.gmra.mrb[32].mxu0 %v340_v21 }
 0x19d   :  { %552 = vmatprep.mubr.f32.mxu1 %v1981_v8  ;;  %713 = vmatprep.mubr.f32.mxu0 %v1981_v8 }
 0x1a0   :  { %553 = vmatmul.mubr.f32.gmra.mrb[18].mxu1 %v341_v23  ;;  %714 = vmatmul.mubr.f32.gmra.mrb[34].mxu0 %v341_v23 }
 0x1a1   :  { %558 = vmatprep.mubr.f32.mxu1 %v1981_v8  ;;  %719 = vmatprep.mubr.f32.mxu0 %v1981_v8 }
 0x1a4   :  { %559 = vmatmul.mubr.f32.gmra.mrb[20].mxu1 %v342_v27  ;;  %720 = vmatmul.mubr.f32.gmra.mrb[36].mxu0 %v342_v27 }
 0x1a5   :  { %564 = vmatprep.mubr.f32.mxu1 %v1981_v8  ;;  %725 = vmatprep.mubr.f32.mxu0 %v1981_v8 }
 0x1a8   :  { %565 = vmatmul.mubr.f32.gmra.mrb[22].mxu1 %v343_v30  ;;  %726 = vmatmul.mubr.f32.gmra.mrb[38].mxu0 %v343_v30 }
 0x1a9   :  { %570 = vmatprep.mubr.f32.mxu1 %v1981_v8  ;;  %731 = vmatprep.mubr.f32.mxu0 %v1981_v8 }
 0x1ac   :  { %571 = vmatmul.mubr.f32.gmra.mrb[24].mxu1 %v344_v34  ;;  %732 = vmatmul.mubr.f32.gmra.mrb[40].mxu0 %v344_v34 }
 0x1ad   :  { %576 = vmatprep.mubr.f32.mxu1 %v1981_v8  ;;  %737 = vmatprep.mubr.f32.mxu0 %v1981_v8 }
 0x1b0   :  { %577 = vmatmul.mubr.f32.gmra.mrb[26].mxu1 %v345_v38  ;;  %738 = vmatmul.mubr.f32.gmra.mrb[42].mxu0 %v345_v38 }
 0x1b1   :  { %582 = vmatprep.mubr.f32.mxu1 %v1981_v8  ;;  %743 = vmatprep.mubr.f32.mxu0 %v1981_v8 }
 0x1b4   :  { %583 = vmatmul.mubr.f32.gmra.mrb[28].mxu1 %v346_v40  ;;  %744 = vmatmul.mubr.f32.gmra.mrb[44].mxu0 %v346_v40 }
 0x1b5   :  { %588 = vmatprep.mubr.f32.mxu1 %v1981_v8  ;;  %749 = vmatprep.mubr.f32.mxu0 %v1981_v8  ;;  %v2246_v8 = vpack.c.bf16 %v1011_v51, %v1010_v50 }
 0x1b7   :  { %1752 = vmatprep.subr.bf16.mxu0 %v2246_v8 }
 0x1b8   :  { %589 = vmatmul.mubr.f32.gmra.mrb[30].mxu1 %v347_v42  ;;  %750 = vmatmul.mubr.f32.gmra.mrb[46].mxu0 %v347_v42 }
 0x1b9   :  { %1754 = vmatpush3.bf16.msra.mxu0 %v2249_v60 }
 0x24f   :  { %v500_v10 = vpop.f32.mrb[0].mxu1  ;;  %v661_v11 = vpop.f32.mrb[16].mxu0 }
 0x250   :  { %v501_v13 = vadd.f32 %v500_v10, %v2253_v63  ;;  %v662_v14 = vadd.f32 %v661_v11, %v2255_v5  ;;  %v502_v16 = vpop.f32.mrb[1].mxu1  ;;  %v663_v17 = vpop.f32.mrb[17].mxu0 }
 0x251   :  { %v503_v18 = vadd.f32 %v502_v16, %v2257_v7  ;;  %v664_v20 = vadd.f32 %v663_v17, %v2259_v9 }
 0x252   :  { %v820_v21 = vmul.f32 0.2, %v501_v13  ;;  %v822_v19 = vmul.f32 0.2, %v662_v14  ;;  %vm756_vm0 = vcmp.gt.f32.partialorder %v501_v13, 0.0  ;;  %vm758_vm1 = vcmp.gt.f32.partialorder %v662_v14, 0.0 }
 0x253   :  { %v821_v22 = vmul.f32 0.2, %v503_v18  ;;  %v823_v23 = vmul.f32 0.2, %v664_v20  ;;  %v506_v24 = vpop.f32.mrb[2].mxu1  ;;  %v667_v25 = vpop.f32.mrb[18].mxu0 }
 0x254   :  { %v507_v27 = vadd.f32 %v506_v24, %v2253_v63  ;;  %v668_v28 = vadd.f32 %v667_v25, %v2255_v5  ;;  %v508_v29 = vpop.f32.mrb[3].mxu1  ;;  %v669_v30 = vpop.f32.mrb[19].mxu0  ;;  %vm757_vm2 = vcmp.gt.f32.partialorder %v503_v18, 0.0  ;;  %vm759_vm3 = vcmp.gt.f32.partialorder %v664_v20, 0.0 }
 0x255   :  { %v509_v32 = vadd.f32 %v508_v29, %v2257_v7  ;;  %v670_v33 = vadd.f32 %v669_v30, %v2259_v9  ;;  %v885_v37 = vsel %vm757_vm2, %v503_v18, %v821_v22  ;;  %v887_v38 = vsel %vm759_vm3, %v664_v20, %v823_v23 }
 0x256   :  { %v824_v34 = vmul.f32 0.2, %v507_v27  ;;  %v826_v35 = vmul.f32 0.2, %v668_v28  ;;  %v884_v39 = vsel %vm756_vm0, %v501_v13, %v820_v21  ;;  %v886_v40 = vsel %vm758_vm1, %v662_v14, %v822_v19  ;;  %1083 = vmatprep.mubr.f32.mxu1 %v885_v37  ;;  %1228 = vmatprep.mubr.f32.mxu0 %v887_v38 }
 0x257   :  { %v825_v42 = vmul.f32 0.2, %v509_v32  ;;  %v827_v15 = vmul.f32 0.2, %v670_v33  ;;  %v512_v44 = vpop.f32.mrb[4].mxu1  ;;  %v673_v46 = vpop.f32.mrb[20].mxu0  ;;  %1084 = vmatmul.mubr.f32.vlgmr.msra.gmra.mrb[32].mxu1 %v884_v39  ;;  %1229 = vmatmul.mubr.f32.vlgmr.msra.gmra.mrb[48].mxu0 %v886_v40 }
 0x258   :  { %v513_v47 = vadd.f32 %v512_v44, %v2253_v63  ;;  %v674_v50 = vadd.f32 %v673_v46, %v2255_v5  ;;  %v514_v51 = vpop.f32.mrb[5].mxu1  ;;  %v675_v52 = vpop.f32.mrb[21].mxu0  ;;  %vm761_vm4 = vcmp.gt.f32.partialorder %v509_v32, 0.0  ;;  %vm763_vm5 = vcmp.gt.f32.partialorder %v670_v33, 0.0  ;;  %1763 = vmatpush3.bf16.msra.mxu1 %v2139_v36 }
 0x259   :  { %v515_v54 = vadd.f32 %v514_v51, %v2257_v7  ;;  %v676_v55 = vadd.f32 %v675_v52, %v2259_v9  ;;  %v889_v56 = vsel %vm761_vm4, %v509_v32, %v825_v42  ;;  %v891_v59 = vsel %vm763_vm5, %v670_v33, %v827_v15  ;;  %1756 = vmatprep.subr.bf16.mxu1 %v2142_v41 }
 0x25a   :  { %v828_v61 = vmul.f32 0.2, %v513_v47  ;;  %v830_v62 = vmul.f32 0.2, %v674_v50  ;;  %1088 = vmatprep.mubr.f32.mxu1 %v889_v56  ;;  %1233 = vmatprep.mubr.f32.mxu0 %v891_v59  ;;  %vm760_vm6 = vcmp.gt.f32.partialorder %v507_v27, 0.0  ;;  %vm762_vm7 = vcmp.gt.f32.partialorder %v668_v28, 0.0 }
 0x25b   :  { %v829_v0 = vmul.f32 0.2, %v515_v54  ;;  %v831_v1 = vmul.f32 0.2, %v676_v55  ;;  %v518_v2 = vpop.f32.mrb[6].mxu1  ;;  %v679_v3 = vpop.f32.mrb[22].mxu0  ;;  %v888_v4 = vsel %vm760_vm6, %v507_v27, %v824_v34  ;;  %v890_v10 = vsel %vm762_vm7, %v668_v28, %v826_v35 }
 0x25c   :  { %v519_v36 = vadd.f32 %v518_v2, %v2253_v63  ;;  %v680_v11 = vadd.f32 %v679_v3, %v2255_v5  ;;  %1089 = vmatmul.mubr.f32.gmra.mrb[34].mxu1 %v888_v4  ;;  %1234 = vmatmul.mubr.f32.gmra.mrb[50].mxu0 %v890_v10  ;;  %v520_v13 = vpop.f32.mrb[7].mxu1  ;;  %v681_v14 = vpop.f32.mrb[23].mxu0  ;;  %vm765_vm8 = vcmp.gt.f32.partialorder %v515_v54, 0.0  ;;  %vm767_vm9 = vcmp.gt.f32.partialorder %v676_v55, 0.0 }
 0x25d   :  { %v521_v16 = vadd.f32 %v520_v13, %v2257_v7  ;;  %v682_v17 = vadd.f32 %v681_v14, %v2259_v9  ;;  %v893_v18 = vsel %vm765_vm8, %v515_v54, %v829_v0  ;;  %v895_v20 = vsel %vm767_vm9, %v676_v55, %v831_v1  ;;  %1764 = vmatpush3.bf16.msra.mxu1 %v2147_v53 }
 0x25e   :  { %v832_v21 = vmul.f32 0.2, %v519_v36  ;;  %v834_v41 = vmul.f32 0.2, %v680_v11  ;;  %1093 = vmatprep.mubr.f32.mxu1 %v893_v18  ;;  %1238 = vmatprep.mubr.f32.mxu0 %v895_v20  ;;  %vm764_vm10 = vcmp.gt.f32.partialorder %v513_v47, 0.0  ;;  %vm766_vm11 = vcmp.gt.f32.partialorder %v674_v50, 0.0 }
 0x25f   :  { %v833_v19 = vmul.f32 0.2, %v521_v16  ;;  %v835_v22 = vmul.f32 0.2, %v682_v17  ;;  %v524_v23 = vpop.f32.mrb[8].mxu1  ;;  %v685_v24 = vpop.f32.mrb[24].mxu0  ;;  %v892_v25 = vsel %vm764_vm10, %v513_v47, %v828_v61  ;;  %v894_v27 = vsel %vm766_vm11, %v674_v50, %v830_v62  ;;  %1757 = vmatprep.subr.bf16.mxu1 %v2152_v58 }
 0x260   :  { %v525_v28 = vadd.f32 %v524_v23, %v2253_v63  ;;  %v686_v29 = vadd.f32 %v685_v24, %v2255_v5  ;;  %1094 = vmatmul.mubr.f32.gmra.mrb[36].mxu1 %v892_v25  ;;  %1239 = vmatmul.mubr.f32.gmra.mrb[52].mxu0 %v894_v27  ;;  %v526_v53 = vpop.f32.mrb[9].mxu1  ;;  %v687_v30 = vpop.f32.mrb[25].mxu0  ;;  %vm769_vm12 = vcmp.gt.f32.partialorder %v521_v16, 0.0  ;;  %vm771_vm13 = vcmp.gt.f32.partialorder %v682_v17, 0.0 }
 0x261   :  { %v527_v32 = vadd.f32 %v526_v53, %v2257_v7  ;;  %v688_v33 = vadd.f32 %v687_v30, %v2259_v9  ;;  %v897_v34 = vsel %vm769_vm12, %v521_v16, %v833_v19  ;;  %v899_v35 = vsel %vm771_vm13, %v682_v17, %v835_v22  ;;  %1765 = vmatpush3.bf16.msra.mxu1 %v2159_v6 }
 0x262   :  { %v836_v37 = vmul.f32 0.2, %v525_v28  ;;  %v838_v58 = vmul.f32 0.2, %v686_v29  ;;  %1098 = vmatprep.mubr.f32.mxu1 %v897_v34  ;;  %1243 = vmatprep.mubr.f32.mxu0 %v899_v35  ;;  %vm768_vm14 = vcmp.gt.f32.partialorder %v519_v36, 0.0  ;;  %vm770_vm15 = vcmp.gt.f32.partialorder %v680_v11, 0.0 }
 0x263   :  { %v837_v38 = vmul.f32 0.2, %v527_v32  ;;  %v839_v39 = vmul.f32 0.2, %v688_v33  ;;  %v530_v40 = vpop.f32.mrb[10].mxu1  ;;  %v691_v42 = vpop.f32.mrb[26].mxu0  ;;  %v896_v15 = vsel %vm768_vm14, %v519_v36, %v832_v21  ;;  %v898_v44 = vsel %vm770_vm15, %v680_v11, %v834_v41  ;;  %1758 = vmatprep.subr.bf16.mxu1 %v2164_v12 }
 0x264   :  { %v531_v46 = vadd.f32 %v530_v40, %v2253_v63  ;;  %v692_v47 = vadd.f32 %v691_v42, %v2255_v5  ;;  %1099 = vmatmul.mubr.f32.gmra.mrb[38].mxu1 %v896_v15  ;;  %1244 = vmatmul.mubr.f32.gmra.mrb[54].mxu0 %v898_v44  ;;  %v532_v6 = vpop.f32.mrb[11].mxu1  ;;  %v693_v50 = vpop.f32.mrb[27].mxu0  ;;  %vm773_vm0 = vcmp.gt.f32.partialorder %v527_v32, 0.0  ;;  %vm775_vm1 = vcmp.gt.f32.partialorder %v688_v33, 0.0 }
 0x265   :  { %v533_v51 = vadd.f32 %v532_v6, %v2257_v7  ;;  %v694_v52 = vadd.f32 %v693_v50, %v2259_v9  ;;  %v901_v54 = vsel %vm773_vm0, %v527_v32, %v837_v38  ;;  %v903_v55 = vsel %vm775_vm1, %v688_v33, %v839_v39  ;;  %1766 = vmatpush3.bf16.msra.mxu1 %v2173_v26 }
 0x266   :  { %v840_v56 = vmul.f32 0.2, %v531_v46  ;;  %v842_v12 = vmul.f32 0.2, %v692_v47  ;;  %1103 = vmatprep.mubr.f32.mxu1 %v901_v54  ;;  %1248 = vmatprep.mubr.f32.mxu0 %v903_v55  ;;  %vm772_vm2 = vcmp.gt.f32.partialorder %v525_v28, 0.0  ;;  %vm774_vm3 = vcmp.gt.f32.partialorder %v686_v29, 0.0 }
 0x267   :  { %v841_v59 = vmul.f32 0.2, %v533_v51  ;;  %v843_v61 = vmul.f32 0.2, %v694_v52  ;;  %v536_v62 = vpop.f32.mrb[12].mxu1  ;;  %v697_v0 = vpop.f32.mrb[28].mxu0  ;;  %v900_v1 = vsel %vm772_vm2, %v525_v28, %v836_v37  ;;  %v902_v2 = vsel %vm774_vm3, %v686_v29, %v838_v58  ;;  %1759 = vmatprep.subr.bf16.mxu1 %v2178_v31 }
 0x268   :  { %v537_v3 = vadd.f32 %v536_v62, %v2253_v63  ;;  %v698_v4 = vadd.f32 %v697_v0, %v2255_v5  ;;  %1104 = vmatmul.mubr.f32.gmra.mrb[40].mxu1 %v900_v1  ;;  %1249 = vmatmul.mubr.f32.gmra.mrb[56].mxu0 %v902_v2  ;;  %v538_v26 = vpop.f32.mrb[13].mxu1  ;;  %v699_v10 = vpop.f32.mrb[29].mxu0  ;;  %vm777_vm4 = vcmp.gt.f32.partialorder %v533_v51, 0.0  ;;  %vm779_vm5 = vcmp.gt.f32.partialorder %v694_v52, 0.0 }
 0x269   :  { %v539_v36 = vadd.f32 %v538_v26, %v2257_v7  ;;  %v700_v11 = vadd.f32 %v699_v10, %v2259_v9  ;;  %v905_v13 = vsel %vm777_vm4, %v533_v51, %v841_v59  ;;  %v907_v14 = vsel %vm779_vm5, %v694_v52, %v843_v61  ;;  %1767 = vmatpush3.bf16.msra.mxu1 %v2187_v43 }
 0x26a   :  { %v844_v16 = vmul.f32 0.2, %v537_v3  ;;  %v846_v31 = vmul.f32 0.2, %v698_v4  ;;  %1108 = vmatprep.mubr.f32.mxu1 %v905_v13  ;;  %1253 = vmatprep.mubr.f32.mxu0 %v907_v14  ;;  %vm776_vm6 = vcmp.gt.f32.partialorder %v531_v46, 0.0  ;;  %vm778_vm7 = vcmp.gt.f32.partialorder %v692_v47, 0.0 }
 0x26b   :  { %v845_v17 = vmul.f32 0.2, %v539_v36  ;;  %v847_v18 = vmul.f32 0.2, %v700_v11  ;;  %v542_v20 = vpop.f32.mrb[14].mxu1  ;;  %v703_v21 = vpop.f32.mrb[30].mxu0  ;;  %v904_v41 = vsel %vm776_vm6, %v531_v46, %v840_v56  ;;  %v906_v19 = vsel %vm778_vm7, %v692_v47, %v842_v12  ;;  %1760 = vmatprep.subr.bf16.mxu1 %v2191_v48 }
 0x26c   :  { %v543_v22 = vadd.f32 %v542_v20, %v2253_v63  ;;  %v704_v23 = vadd.f32 %v703_v21, %v2255_v5  ;;  %1109 = vmatmul.mubr.f32.gmra.mrb[42].mxu1 %v904_v41  ;;  %1254 = vmatmul.mubr.f32.gmra.mrb[58].mxu0 %v906_v19  ;;  %v544_v43 = vpop.f32.mrb[15].mxu1  ;;  %v705_v24 = vpop.f32.mrb[31].mxu0  ;;  %vm781_vm8 = vcmp.gt.f32.partialorder %v539_v36, 0.0  ;;  %vm783_vm9 = vcmp.gt.f32.partialorder %v700_v11, 0.0 }
 0x26d   :  { %v545_v25 = vadd.f32 %v544_v43, %v2257_v7  ;;  %v706_v27 = vadd.f32 %v705_v24, %v2259_v9  ;;  %v909_v28 = vsel %vm781_vm8, %v539_v36, %v845_v17  ;;  %v911_v29 = vsel %vm783_vm9, %v700_v11, %v847_v18  ;;  %1768 = vmatpush3.bf16.msra.mxu1 %v2198_v57 }
 0x26e   :  { %v848_v53 = vmul.f32 0.2, %v543_v22  ;;  %v850_v48 = vmul.f32 0.2, %v704_v23  ;;  %1113 = vmatprep.mubr.f32.mxu1 %v909_v28  ;;  %1258 = vmatprep.mubr.f32.mxu0 %v911_v29  ;;  %vm780_vm10 = vcmp.gt.f32.partialorder %v537_v3, 0.0  ;;  %vm782_vm11 = vcmp.gt.f32.partialorder %v698_v4, 0.0 }
 0x26f   :  { %v849_v30 = vmul.f32 0.2, %v545_v25  ;;  %v851_v32 = vmul.f32 0.2, %v706_v27  ;;  %v548_v33 = vpop.f32.mrb[16].mxu1  ;;  %v709_v34 = vpop.f32.mrb[32].mxu0  ;;  %v908_v35 = vsel %vm780_vm10, %v537_v3, %v844_v16  ;;  %v910_v37 = vsel %vm782_vm11, %v698_v4, %v846_v31  ;;  %1761 = vmatprep.subr.bf16.mxu1 %v2240_v45 }
 0x270   :  { %v549_v58 = vadd.f32 %v548_v33, %v2253_v63  ;;  %v710_v38 = vadd.f32 %v709_v34, %v2255_v5  ;;  %1114 = vmatmul.mubr.f32.gmra.mrb[44].mxu1 %v908_v35  ;;  %1259 = vmatmul.mubr.f32.gmra.mrb[60].mxu0 %v910_v37  ;;  %v550_v57 = vpop.f32.mrb[17].mxu1  ;;  %v711_v39 = vpop.f32.mrb[33].mxu0  ;;  %vm785_vm12 = vcmp.gt.f32.partialorder %v545_v25, 0.0  ;;  %vm787_vm13 = vcmp.gt.f32.partialorder %v706_v27, 0.0 }
 0x271   :  { %v551_v40 = vadd.f32 %v550_v57, %v2257_v7  ;;  %v712_v42 = vadd.f32 %v711_v39, %v2259_v9  ;;  %v913_v15 = vsel %vm785_vm12, %v545_v25, %v849_v30  ;;  %v915_v44 = vsel %vm787_vm13, %v706_v27, %v851_v32  ;;  %1769 = vmatpush3.bf16.msra.mxu1 %v2242_v49 }
 0x272   :  { %v852_v46 = vmul.f32 0.2, %v549_v58  ;;  %v854_v45 = vmul.f32 0.2, %v710_v38  ;;  %1118 = vmatprep.mubr.f32.mxu1 %v913_v15  ;;  %1263 = vmatprep.mubr.f32.mxu0 %v915_v44  ;;  %vm784_vm14 = vcmp.gt.f32.partialorder %v543_v22, 0.0  ;;  %vm786_vm15 = vcmp.gt.f32.partialorder %v704_v23, 0.0 }
 0x273   :  { %v853_v47 = vmul.f32 0.2, %v551_v40  ;;  %v855_v6 = vmul.f32 0.2, %v712_v42  ;;  %v554_v50 = vpop.f32.mrb[18].mxu1  ;;  %v715_v51 = vpop.f32.mrb[34].mxu0  ;;  %v912_v52 = vsel %vm784_vm14, %v543_v22, %v848_v53  ;;  %v914_v54 = vsel %vm786_vm15, %v704_v23, %v850_v48  ;;  %1762 = vmatprep.subr.bf16.mxu1 %v2246_v8 }
 0x274   :  { %v555_v55 = vadd.f32 %v554_v50, %v2253_v63  ;;  %v716_v56 = vadd.f32 %v715_v51, %v2255_v5  ;;  %1119 = vmatmul.mubr.f32.gmra.mrb[46].mxu1 %v912_v52  ;;  %1264 = vmatmul.mubr.f32.gmra.mrb[62].mxu0 %v914_v54  ;;  %v556_v49 = vpop.f32.mrb[19].mxu1  ;;  %v717_v12 = vpop.f32.mrb[35].mxu0  ;;  %vm789_vm0 = vcmp.gt.f32.partialorder %v551_v40, 0.0  ;;  %vm791_vm1 = vcmp.gt.f32.partialorder %v712_v42, 0.0 }
 0x275   :  { %v557_v59 = vadd.f32 %v556_v49, %v2257_v7  ;;  %v718_v61 = vadd.f32 %v717_v12, %v2259_v9  ;;  %v917_v62 = vsel %vm789_vm0, %v551_v40, %v853_v47  ;;  %v919_v0 = vsel %vm791_vm1, %v712_v42, %v855_v6  ;;  %1770 = vmatpush3.bf16.msra.mxu1 %v2249_v60 }
 0x276   :  { %v856_v1 = vmul.f32 0.2, %v555_v55  ;;  %v858_v8 = vmul.f32 0.2, %v716_v56  ;;  %1123 = vmatprep.mubr.f32.mxu1 %v917_v62  ;;  %1268 = vmatprep.mubr.f32.mxu0 %v919_v0  ;;  %vm788_vm2 = vcmp.gt.f32.partialorder %v549_v58, 0.0  ;;  %vm790_vm3 = vcmp.gt.f32.partialorder %v710_v38, 0.0 }
 0x277   :  { %v857_v2 = vmul.f32 0.2, %v557_v59  ;;  %v859_v3 = vmul.f32 0.2, %v718_v61  ;;  %v560_v4 = vpop.f32.mrb[20].mxu1  ;;  %v721_v26 = vpop.f32.mrb[36].mxu0  ;;  %v916_v10 = vsel %vm788_vm2, %v549_v58, %v852_v46  ;;  %v918_v36 = vsel %vm790_vm3, %v710_v38, %v854_v45 }
 0x278   :  { %v561_v11 = vadd.f32 %v560_v4, %v2253_v63  ;;  %v722_v13 = vadd.f32 %v721_v26, %v2255_v5  ;;  %1124 = vmatmul.mubr.f32.gmra.mrb[48].mxu1 %v916_v10  ;;  %1269 = vmatmul.mubr.f32.gmra.mrb[64].mxu0 %v918_v36  ;;  %v562_v14 = vpop.f32.mrb[21].mxu1  ;;  %v723_v60 = vpop.f32.mrb[37].mxu0  ;;  %vm793_vm4 = vcmp.gt.f32.partialorder %v557_v59, 0.0  ;;  %vm795_vm5 = vcmp.gt.f32.partialorder %v718_v61, 0.0 }
 0x279   :  { %v563_v16 = vadd.f32 %v562_v14, %v2257_v7  ;;  %v724_v31 = vadd.f32 %v723_v60, %v2259_v9  ;;  %v921_v17 = vsel %vm793_vm4, %v557_v59, %v857_v2  ;;  %v923_v18 = vsel %vm795_vm5, %v718_v61, %v859_v3 }
 0x27a   :  { %v860_v20 = vmul.f32 0.2, %v561_v11  ;;  %v862_v21 = vmul.f32 0.2, %v722_v13  ;;  %1128 = vmatprep.mubr.f32.mxu1 %v921_v17  ;;  %1273 = vmatprep.mubr.f32.mxu0 %v923_v18  ;;  %vm792_vm6 = vcmp.gt.f32.partialorder %v555_v55, 0.0  ;;  %vm794_vm7 = vcmp.gt.f32.partialorder %v716_v56, 0.0 }
 0x27b   :  { %v861_v41 = vmul.f32 0.2, %v563_v16  ;;  %v863_v19 = vmul.f32 0.2, %v724_v31  ;;  %v566_v22 = vpop.f32.mrb[22].mxu1  ;;  %v727_v23 = vpop.f32.mrb[38].mxu0  ;;  %v920_v43 = vsel %vm792_vm6, %v555_v55, %v856_v1  ;;  %v922_v24 = vsel %vm794_vm7, %v716_v56, %v858_v8 }
 0x27c   :  { %v567_v25 = vadd.f32 %v566_v22, %v2253_v63  ;;  %v728_v27 = vadd.f32 %v727_v23, %v2255_v5  ;;  %1129 = vmatmul.mubr.f32.gmra.mrb[50].mxu1 %v920_v43  ;;  %1274 = vmatmul.mubr.f32.gmra.mrb[66].mxu0 %v922_v24  ;;  %v568_v28 = vpop.f32.mrb[23].mxu1  ;;  %v729_v29 = vpop.f32.mrb[39].mxu0  ;;  %vm797_vm8 = vcmp.gt.f32.partialorder %v563_v16, 0.0  ;;  %vm799_vm9 = vcmp.gt.f32.partialorder %v724_v31, 0.0 }
 0x27d   :  { %v569_v53 = vadd.f32 %v568_v28, %v2257_v7  ;;  %v730_v48 = vadd.f32 %v729_v29, %v2259_v9  ;;  %v925_v30 = vsel %vm797_vm8, %v563_v16, %v861_v41  ;;  %v927_v32 = vsel %vm799_vm9, %v724_v31, %v863_v19 }
 0x27e   :  { %v864_v33 = vmul.f32 0.2, %v567_v25  ;;  %1133 = vmatprep.mubr.f32.mxu1 %v925_v30  ;;  %1278 = vmatprep.mubr.f32.mxu0 %v927_v32  ;;  %vm796_vm10 = vcmp.gt.f32.partialorder %v561_v11, 0.0  ;;  %vm798_vm11 = vcmp.gt.f32.partialorder %v722_v13, 0.0  ;;  %v866_v44 = vmul.f32 0.2, %v728_v27 }
 0x27f   :  { %v865_v34 = vmul.f32 0.2, %v569_v53  ;;  %v867_v35 = vmul.f32 0.2, %v730_v48  ;;  %v572_v37 = vpop.f32.mrb[24].mxu1  ;;  %v733_v58 = vpop.f32.mrb[40].mxu0  ;;  %v924_v38 = vsel %vm796_vm10, %v561_v11, %v860_v20  ;;  %v926_v57 = vsel %vm798_vm11, %v722_v13, %v862_v21 }
 0x280   :  { %v573_v39 = vadd.f32 %v572_v37, %v2253_v63  ;;  %v2326_v40 = vadd.f32 %v733_v58, %v2255_v5  ;;  %1134 = vmatmul.mubr.f32.gmra.mrb[52].mxu1 %v924_v38  ;;  %1279 = vmatmul.mubr.f32.gmra.mrb[68].mxu0 %v926_v57  ;;  %v574_v42 = vpop.f32.mrb[25].mxu1  ;;  %v735_v15 = vpop.f32.mrb[41].mxu0  ;;  %vm801_vm12 = vcmp.gt.f32.partialorder %v569_v53, 0.0  ;;  %vm803_vm13 = vcmp.gt.f32.partialorder %v730_v48, 0.0 }
 0x281   :  { %v575_v46 = vadd.f32 %v574_v42, %v2257_v7  ;;  %v929_v45 = vsel %vm801_vm12, %v569_v53, %v865_v34  ;;  %v931_v47 = vsel %vm803_vm13, %v730_v48, %v867_v35  ;;  %vm800_vm14 = vcmp.gt.f32.partialorder %v567_v25, 0.0 }
 0x282   :  { %1138 = vmatprep.mubr.f32.mxu1 %v929_v45  ;;  %1283 = vmatprep.mubr.f32.mxu0 %v931_v47  ;;  %v868_v6 = vmul.f32 0.2, %v573_v39  ;;  %v928_v54 = vsel %vm800_vm14, %v567_v25, %v864_v33  ;;  %vm802_vm15 = vcmp.gt.f32.partialorder %v728_v27, 0.0  ;;  %vm804_vm1 = vcmp.gt.f32.partialorder %v573_v39, 0.0 }
 0x283   :  { %v869_v50 = vmul.f32 0.2, %v575_v46  ;;  %v578_v51 = vpop.f32.mrb[26].mxu1  ;;  %v739_v52 = vpop.f32.mrb[42].mxu0  ;;  %v930_v59 = vsel %vm802_vm15, %v728_v27, %v866_v44  ;;  %vm805_vm0 = vcmp.gt.f32.partialorder %v575_v46, 0.0  ;;  %v736_v16 = vadd.f32 %v735_v15, %v2259_v9 }
 0x284   :  { %v579_v55 = vadd.f32 %v578_v51, %v2253_v63  ;;  %v2331_v56 = vadd.f32 %v739_v52, %v2255_v5  ;;  %1139 = vmatmul.mubr.f32.gmra.mrb[54].mxu1 %v928_v54  ;;  %v580_v49 = vpop.f32.mrb[27].mxu1  ;;  %v741_v12 = vpop.f32.mrb[43].mxu0  ;;  %1284 = vmatmul.mubr.f32.gmra.mrb[70].mxu0 %v930_v59  ;;  %v932_v4 = vsel %vm804_vm1, %v573_v39, %v868_v6  ;;  %vm806_vm9 = vcmp.gt.f32.partialorder %v2326_v40, 0.0 }
 0x285   :  { %v581_v61 = vadd.f32 %v580_v49, %v2257_v7  ;;  %v742_v62 = vadd.f32 %v741_v12, %v2259_v9  ;;  %v933_v0 = vsel %vm805_vm0, %v575_v46, %v869_v50  ;;  %v871_v53 = vmul.f32 0.2, %v736_v16  ;;  %v2355_v46 = vld [vmem:[#allocation13] ss:$0 sm:$0xff] }
 0x286   :  { %v872_v1 = vmul.f32 0.2, %v579_v55  ;;  %1143 = vmatprep.mubr.f32.mxu1 %v933_v0  ;;  %vm808_vm3 = vcmp.gt.f32.partialorder %v579_v55, 0.0  ;;  %vm807_vm8 = vcmp.gt.f32.partialorder %v736_v16, 0.0  ;;  %v874_v32 = vmul.f32 0.2, %v2331_v56 }
 0x287   :  { %v873_v8 = vmul.f32 0.2, %v581_v61  ;;  %v584_v2 = vpop.f32.mrb[28].mxu1  ;;  %v745_v3 = vpop.f32.mrb[44].mxu0  ;;  %vm809_vm2 = vcmp.gt.f32.partialorder %v581_v61, 0.0  ;;  %vm811_vm10 = vcmp.gt.f32.partialorder %v742_v62, 0.0 }
 0x288   :  { %v585_v26 = vadd.f32 %v584_v2, %v2253_v63  ;;  %v2337_v10 = vadd.f32 %v745_v3, %v2255_v5  ;;  %1144 = vmatmul.mubr.f32.gmra.mrb[56].mxu1 %v932_v4  ;;  %v586_v36 = vpop.f32.mrb[29].mxu1  ;;  %v747_v11 = vpop.f32.mrb[45].mxu0  ;;  %v936_v21 = vsel %vm808_vm3, %v579_v55, %v872_v1  ;;  %vm810_vm11 = vcmp.gt.f32.partialorder %v2331_v56, 0.0 }
 0x289   :  { %v587_v13 = vadd.f32 %v586_v36, %v2257_v7  ;;  %v748_v14 = vadd.f32 %v747_v11, %v2259_v9  ;;  %v937_v60 = vsel %vm809_vm2, %v581_v61, %v873_v8  ;;  %v938_v37 = vsel %vm810_vm11, %v2331_v56, %v874_v32 }
 0x28a   :  { %1148 = vmatprep.mubr.f32.mxu1 %v937_v60  ;;  %v876_v31 = vmul.f32 0.2, %v585_v26  ;;  %vm812_vm5 = vcmp.gt.f32.partialorder %v585_v26, 0.0  ;;  %v878_v35 = vmul.f32 0.2, %v2337_v10  ;;  %vm814_vm13 = vcmp.gt.f32.partialorder %v2337_v10, 0.0 }
 0x28b   :  { %v877_v17 = vmul.f32 0.2, %v587_v13  ;;  %v590_v18 = vpop.f32.mrb[30].mxu1  ;;  %v751_v20 = vpop.f32.mrb[46].mxu0  ;;  %vm813_vm4 = vcmp.gt.f32.partialorder %v587_v13, 0.0  ;;  %vm815_vm12 = vcmp.gt.f32.partialorder %v748_v14, 0.0 }
 0x28c   :  { %v591_v41 = vadd.f32 %v590_v18, %v2253_v63  ;;  %v752_v19 = vadd.f32 %v751_v20, %v2255_v5  ;;  %1149 = vmatmul.mubr.f32.gmra.mrb[58].mxu1 %v936_v21  ;;  %v592_v22 = vpop.f32.mrb[31].mxu1  ;;  %v753_v23 = vpop.f32.mrb[47].mxu0  ;;  %v940_v29 = vsel %vm812_vm5, %v585_v26, %v876_v31  ;;  %v870_v5 = vmul.f32 0.2, %v2326_v40 }
 0x28d   :  { %v593_v43 = vadd.f32 %v592_v22, %v2257_v7  ;;  %v754_v24 = vadd.f32 %v753_v23, %v2259_v9  ;;  %v941_v25 = vsel %vm813_vm4, %v587_v13, %v877_v17  ;;  %v875_v7 = vmul.f32 0.2, %v742_v62 }
 0x28e   :  { %1153 = vmatprep.mubr.f32.mxu1 %v941_v25  ;;  %v880_v27 = vmul.f32 0.2, %v591_v41  ;;  %vm816_vm7 = vcmp.gt.f32.partialorder %v591_v41, 0.0  ;;  %v935_v9 = vsel %vm807_vm8, %v736_v16, %v871_v53  ;;  %v934_v30 = vsel %vm806_vm9, %v2326_v40, %v870_v5 }
 0x28f   :  { %v881_v28 = vmul.f32 0.2, %v593_v43  ;;  %vm817_vm6 = vcmp.gt.f32.partialorder %v593_v43, 0.0  ;;  %v879_v33 = vmul.f32 0.2, %v748_v14  ;;  %v939_v34 = vsel %vm811_vm10, %v742_v62, %v875_v7 }
 0x290   :  { %1154 = vmatmul.mubr.f32.gmra.mrb[60].mxu1 %v940_v29  ;;  %v944_v48 = vsel %vm816_vm7, %v591_v41, %v880_v27  ;;  %v883_v58 = vmul.f32 0.2, %v754_v24  ;;  %vm819_vm14 = vcmp.gt.f32.partialorder %v754_v24, 0.0  ;;  %v882_v57 = vmul.f32 0.2, %v752_v19 }
 0x291   :  { %v945_v63 = vsel %vm817_vm6, %v593_v43, %v881_v28  ;;  %v943_v38 = vsel %vm815_vm12, %v748_v14, %v879_v33  ;;  %v942_v39 = vsel %vm814_vm13, %v2337_v10, %v878_v35  ;;  %vm818_vm15 = vcmp.gt.f32.partialorder %v752_v19, 0.0 }
 0x292   :  { %1158 = vmatprep.mubr.f32.mxu1 %v945_v63  ;;  %v947_v40 = vsel %vm819_vm14, %v754_v24, %v883_v58  ;;  %v946_v42 = vsel %vm818_vm15, %v752_v19, %v882_v57 }
 0x294   :  { %1159 = vmatmul.mubr.f32.gmra.mrb[62].mxu1 %v944_v48 }
 0x295   :  { %1288 = vmatprep.mubr.f32.mxu1 %v935_v9 }
 0x298   :  { %1289 = vmatmul.mubr.f32.vlgmr.msra.gmra.mrb[64].mxu1 %v934_v30 }
 0x299   :  { %1293 = vmatprep.mubr.f32.mxu1 %v939_v34 }
 0x29c   :  { %1294 = vmatmul.mubr.f32.gmra.mrb[66].mxu1 %v938_v37 }
 0x29d   :  { %1298 = vmatprep.mubr.f32.mxu1 %v943_v38 }
 0x2a0   :  { %1299 = vmatmul.mubr.f32.gmra.mrb[68].mxu1 %v942_v39 }
 0x2a1   :  { %1303 = vmatprep.mubr.f32.mxu1 %v947_v40 }
 0x2a4   :  { %1304 = vmatmul.mubr.f32.gmra.mrb[70].mxu1 %v946_v42 }
 0x32a   :  { %v1411_v15 = vpop.f32.mrb[32].mxu1  ;;  %v1491_v44 = vpop.f32.mrb[48].mxu0 }
 0x32b   :  { %v1412_v45 = vpop.f32.mrb[33].mxu1  ;;  %v1492_v47 = vpop.f32.mrb[49].mxu0 }
 0x32c   :  { %v1413_v6 = vadd.f32 %v1412_v45, %v1411_v15  ;;  %v1493_v50 = vadd.f32 %v1492_v47, %v1491_v44 }
 0x32e   :  { %v1086_v51 = vadd.f32 %v1413_v6, %v2355_v46 }
 0x32f   :  { %v1414_v52 = vpop.f32.mrb[34].mxu1  ;;  %v1494_v54 = vpop.f32.mrb[50].mxu0 }
 0x330   :  { %v1415_v55 = vpop.f32.mrb[35].mxu1  ;;  %v1495_v56 = vpop.f32.mrb[51].mxu0  ;;  %v1231_v49 = vadd.f32 %v1493_v50, %v1086_v51 }
 0x331   :  { %v1416_v12 = vadd.f32 %v1415_v55, %v1414_v52  ;;  %v1496_v59 = vadd.f32 %v1495_v56, %v1494_v54 }
 0x332   :  { %1309 = vst [vmem:[#allocation14] sm:$0xff] %v1231_v49 }
 0x333   :  { %v1091_v61 = vadd.f32 %v1416_v12, %v2355_v46  ;;  %v1417_v62 = vpop.f32.mrb[36].mxu1  ;;  %v1497_v0 = vpop.f32.mrb[52].mxu0 }
 0x334   :  { %v1418_v1 = vpop.f32.mrb[37].mxu1  ;;  %v1498_v8 = vpop.f32.mrb[53].mxu0 }
 0x335   :  { %v1236_v2 = vadd.f32 %v1496_v59, %v1091_v61  ;;  %v1419_v3 = vadd.f32 %v1418_v1, %v1417_v62  ;;  %v1499_v4 = vadd.f32 %v1498_v8, %v1497_v0 }
 0x337   :  { %1310 = vst [vmem:[#allocation14 + $0x8] sm:$0xff] %v1236_v2  ;;  %v1096_v26 = vadd.f32 %v1419_v3, %v2355_v46  ;;  %v1420_v10 = vpop.f32.mrb[38].mxu1  ;;  %v1500_v36 = vpop.f32.mrb[54].mxu0 }
 0x338   :  { %v1421_v11 = vpop.f32.mrb[39].mxu1  ;;  %v1501_v13 = vpop.f32.mrb[55].mxu0 }
 0x339   :  { %v1241_v14 = vadd.f32 %v1499_v4, %v1096_v26  ;;  %v1422_v60 = vadd.f32 %v1421_v11, %v1420_v10  ;;  %v1502_v16 = vadd.f32 %v1501_v13, %v1500_v36 }
 0x33b   :  { %1311 = vst [vmem:[#allocation14 + $0x10] sm:$0xff] %v1241_v14  ;;  %v1101_v31 = vadd.f32 %v1422_v60, %v2355_v46  ;;  %v1423_v17 = vpop.f32.mrb[40].mxu1  ;;  %v1503_v18 = vpop.f32.mrb[56].mxu0 }
 0x33c   :  { %v1424_v20 = vpop.f32.mrb[41].mxu1  ;;  %v1504_v21 = vpop.f32.mrb[57].mxu0 }
 0x33d   :  { %v1246_v41 = vadd.f32 %v1502_v16, %v1101_v31  ;;  %v1425_v19 = vadd.f32 %v1424_v20, %v1423_v17  ;;  %v1505_v22 = vadd.f32 %v1504_v21, %v1503_v18 }
 0x33f   :  { %1312 = vst [vmem:[#allocation14 + $0x18] sm:$0xff] %v1246_v41  ;;  %v1106_v23 = vadd.f32 %v1425_v19, %v2355_v46  ;;  %v1426_v43 = vpop.f32.mrb[42].mxu1  ;;  %v1506_v24 = vpop.f32.mrb[58].mxu0 }
 0x340   :  { %v1427_v25 = vpop.f32.mrb[43].mxu1  ;;  %v1507_v27 = vpop.f32.mrb[59].mxu0 }
 0x341   :  { %v1251_v28 = vadd.f32 %v1505_v22, %v1106_v23  ;;  %v1428_v29 = vadd.f32 %v1427_v25, %v1426_v43  ;;  %v1508_v53 = vadd.f32 %v1507_v27, %v1506_v24 }
 0x343   :  { %1313 = vst [vmem:[#allocation14 + $0x20] sm:$0xff] %v1251_v28  ;;  %v1111_v63 = vadd.f32 %v1428_v29, %v2355_v46  ;;  %v1429_v5 = vpop.f32.mrb[44].mxu1  ;;  %v1509_v48 = vpop.f32.mrb[60].mxu0 }
 0x344   :  { %v1430_v7 = vpop.f32.mrb[45].mxu1  ;;  %v1510_v9 = vpop.f32.mrb[61].mxu0 }
 0x345   :  { %v1256_v30 = vadd.f32 %v1508_v53, %v1111_v63  ;;  %v1431_v32 = vadd.f32 %v1430_v7, %v1429_v5  ;;  %v1511_v33 = vadd.f32 %v1510_v9, %v1509_v48 }
 0x347   :  { %1314 = vst [vmem:[#allocation14 + $0x28] sm:$0xff] %v1256_v30  ;;  %v1116_v34 = vadd.f32 %v1431_v32, %v2355_v46  ;;  %v1432_v35 = vpop.f32.mrb[46].mxu1  ;;  %v1512_v37 = vpop.f32.mrb[62].mxu0 }
 0x348   :  { %v1433_v58 = vpop.f32.mrb[47].mxu1  ;;  %v1513_v38 = vpop.f32.mrb[63].mxu0 }
 0x349   :  { %v1261_v57 = vadd.f32 %v1511_v33, %v1116_v34  ;;  %v1434_v39 = vadd.f32 %v1433_v58, %v1432_v35  ;;  %v1514_v40 = vadd.f32 %v1513_v38, %v1512_v37 }
 0x34b   :  { %1315 = vst [vmem:[#allocation14 + $0x30] sm:$0xff] %v1261_v57  ;;  %v1121_v42 = vadd.f32 %v1434_v39, %v2355_v46  ;;  %v1435_v15 = vpop.f32.mrb[48].mxu1  ;;  %v1515_v44 = vpop.f32.mrb[64].mxu0 }
 0x34c   :  { %v1436_v45 = vpop.f32.mrb[49].mxu1  ;;  %v1516_v47 = vpop.f32.mrb[65].mxu0 }
 0x34d   :  { %v1266_v6 = vadd.f32 %v1514_v40, %v1121_v42  ;;  %v1437_v50 = vadd.f32 %v1436_v45, %v1435_v15  ;;  %v1517_v51 = vadd.f32 %v1516_v47, %v1515_v44 }
 0x34f   :  { %1316 = vst [vmem:[#allocation14 + $0x38] sm:$0xff] %v1266_v6  ;;  %v1126_v52 = vadd.f32 %v1437_v50, %v2355_v46  ;;  %v1438_v54 = vpop.f32.mrb[50].mxu1  ;;  %v1518_v55 = vpop.f32.mrb[66].mxu0 }
 0x350   :  { %v1439_v56 = vpop.f32.mrb[51].mxu1  ;;  %v1519_v49 = vpop.f32.mrb[67].mxu0 }
 0x351   :  { %v1271_v12 = vadd.f32 %v1517_v51, %v1126_v52  ;;  %v1440_v59 = vadd.f32 %v1439_v56, %v1438_v54  ;;  %v1520_v61 = vadd.f32 %v1519_v49, %v1518_v55 }
 0x353   :  { %1317 = vst [vmem:[#allocation14 + $0x40] sm:$0xff] %v1271_v12  ;;  %v1131_v62 = vadd.f32 %v1440_v59, %v2355_v46  ;;  %v1441_v0 = vpop.f32.mrb[52].mxu1  ;;  %v1521_v1 = vpop.f32.mrb[68].mxu0 }
 0x354   :  { %v1442_v8 = vpop.f32.mrb[53].mxu1  ;;  %v1522_v2 = vpop.f32.mrb[69].mxu0 }
 0x355   :  { %v1276_v3 = vadd.f32 %v1520_v61, %v1131_v62  ;;  %v1443_v4 = vadd.f32 %v1442_v8, %v1441_v0  ;;  %v1523_v26 = vadd.f32 %v1522_v2, %v1521_v1 }
 0x357   :  { %1318 = vst [vmem:[#allocation14 + $0x48] sm:$0xff] %v1276_v3  ;;  %v1136_v10 = vadd.f32 %v1443_v4, %v2355_v46  ;;  %v1444_v36 = vpop.f32.mrb[54].mxu1  ;;  %v1524_v14 = vpop.f32.mrb[70].mxu0 }
 0x358   :  { %v1445_v11 = vpop.f32.mrb[55].mxu1  ;;  %v1525_v16 = vpop.f32.mrb[71].mxu0 }
 0x359   :  { %v1281_v13 = vadd.f32 %v1523_v26, %v1136_v10  ;;  %v1446_v60 = vadd.f32 %v1445_v11, %v1444_v36  ;;  %v1526_v17 = vadd.f32 %v1525_v16, %v1524_v14 }
 0x35b   :  { %1319 = vst [vmem:[#allocation14 + $0x50] sm:$0xff] %v1281_v13  ;;  %v1141_v31 = vadd.f32 %v1446_v60, %v2355_v46  ;;  %v1447_v18 = vpop.f32.mrb[56].mxu1 }
 0x35c   :  { %v1448_v20 = vpop.f32.mrb[57].mxu1 }
 0x35d   :  { %v1286_v21 = vadd.f32 %v1526_v17, %v1141_v31  ;;  %v1449_v41 = vadd.f32 %v1448_v20, %v1447_v18 }
 0x35f   :  { %1320 = vst [vmem:[#allocation14 + $0x58] sm:$0xff] %v1286_v21  ;;  %v1450_v19 = vpop.f32.mrb[58].mxu1  ;;  %v1146_v9 = vadd.f32 %v1449_v41, %v2355_v46 }
 0x360   :  { %v1451_v22 = vpop.f32.mrb[59].mxu1 }
 0x361   :  { %v1452_v23 = vadd.f32 %v1451_v22, %v1450_v19 }
 0x363   :  { %v1151_v43 = vadd.f32 %v1452_v23, %v2355_v46  ;;  %v1453_v24 = vpop.f32.mrb[60].mxu1 }
 0x364   :  { %v1454_v25 = vpop.f32.mrb[61].mxu1 }
 0x365   :  { %v1455_v27 = vadd.f32 %v1454_v25, %v1453_v24 }
 0x367   :  { %v1156_v28 = vadd.f32 %v1455_v27, %v2355_v46  ;;  %v1456_v29 = vpop.f32.mrb[62].mxu1 }
 0x368   :  { %v1457_v53 = vpop.f32.mrb[63].mxu1 }
 0x369   :  { %v1458_v63 = vadd.f32 %v1457_v53, %v1456_v29 }
 0x36b   :  { %v1161_v5 = vadd.f32 %v1458_v63, %v2355_v46  ;;  %v1527_v48 = vpop.f32.mrb[64].mxu1 }
 0x36c   :  { %v1528_v7 = vpop.f32.mrb[65].mxu1 }
 0x36d   :  { %v1529_v30 = vadd.f32 %v1528_v7, %v1527_v48 }
 0x36f   :  { %v1291_v32 = vadd.f32 %v1529_v30, %v1146_v9  ;;  %v1530_v33 = vpop.f32.mrb[66].mxu1 }
 0x370   :  { %v1531_v34 = vpop.f32.mrb[67].mxu1 }
 0x371   :  { %1321 = vst [vmem:[#allocation14 + $0x60] sm:$0xff] %v1291_v32  ;;  %v1532_v35 = vadd.f32 %v1531_v34, %v1530_v33 }
 0x373   :  { %v1296_v37 = vadd.f32 %v1532_v35, %v1151_v43  ;;  %v1533_v58 = vpop.f32.mrb[68].mxu1 }
 0x374   :  { %v1534_v38 = vpop.f32.mrb[69].mxu1 }
 0x375   :  { %1322 = vst [vmem:[#allocation14 + $0x68] sm:$0xff] %v1296_v37  ;;  %v1535_v57 = vadd.f32 %v1534_v38, %v1533_v58 }
 0x377   :  { %v1301_v39 = vadd.f32 %v1535_v57, %v1156_v28  ;;  %v1536_v40 = vpop.f32.mrb[70].mxu1 }
 0x378   :  { %v1537_v42 = vpop.f32.mrb[71].mxu1 }
 0x379   :  { %1323 = vst [vmem:[#allocation14 + $0x70] sm:$0xff] %v1301_v39  ;;  %v1538_v15 = vadd.f32 %v1537_v42, %v1536_v40 }
 0x37b   :  { %v1306_v44 = vadd.f32 %v1538_v15, %v1161_v5 }
 0x37d   :  { %1324 = vst [vmem:[#allocation14 + $0x78] sm:$0xff] %v1306_v44 }
 0x37e   :  { %1949 = shalt.err (!%p1946_p4)
}
 0x37f   :  { %s1950_s20 = scalar_lea.hbm %s2395_s7, 2048 }
 0x380   :  { %p1951_p5 = scmp.ne.s32.totalorder %s2395_s7, %s1950_s20  ;;  %p1954_p6 = scmp.lt.u32.totalorder %s1950_s20, %s2395_s7 }
 0x382   :  { %p1956_p7 = pnand %p1954_p6, %p1951_p5 }
 0x384   :  { %1959 = shalt.err (!%p1956_p7)
}
 0x385   :  { %1336 = dma.vmem_to_hbm [thread:$0]  %s1331_s0, 2048, %s2395_s7, [#allocation4], %s1972_s13, %s1972_s13, %s1973_s14  }
 0x386   :  { %1968 = dma.done.wait [#allocation4], 2048  }
 0x387   :  { %1969 = vsyncadd [#allocation4], 4294965248 }
 0x388   :  { %1340 = vsyncpa [#allocation3], 1 }
 0x389   :  { %1341 = vsyncpa [#allocation6], 1 }
 0x38a   :  { %1342 = vsyncpa [#allocation9], 1 }
 0x38b   :  { %1343 = vsyncpa [#allocation12], 1 }
 0x38c   :  { %1344 = vsyncpa [#allocation4], 1 }

</bundles_post_ra>
